<compile_context>
chip_gen: v6e
topology: v6e:2x2x1
jax: 0.10.0
libtpu: 0.0.40
codegen_flags: <defaults>
</compile_context>

<pallas_src>
import functools

import numpy as np
import jax
import jax.numpy as jnp
from jax import lax
from jax.experimental import pallas as pl
from jax.experimental.pallas import tpu as pltpu


# -----------------------------------------------------------------------------
# Pallas kernels
# -----------------------------------------------------------------------------
def _upsample_kernel(x_ref, wxT_ref, wy_ref, o_ref):
    # x_ref:   (rb, H, W)      bf16
    # wxT_ref: (W, Wout)       bf16   (transpose of the W-axis interp matrix)
    # wy_ref:  (Hout, H)       bf16   (H-axis interp matrix)
    # o_ref:   (rb, Hout, Wout) f32
    rb, H, W = x_ref.shape
    Wout = wxT_ref.shape[1]
    Hout = wy_ref.shape[0]

    x = x_ref[...]
    wxT_b = jnp.broadcast_to(wxT_ref[...], (rb, W, Wout))    # hoisted once
    wy_b = jnp.broadcast_to(wy_ref[...], (rb, Hout, H))

    # interpolate along W: (rb, H, W) @ (W, Wout) -> (rb, H, Wout)
    t = jnp.einsum("rhw,rwv->rhv", x, wxT_b, preferred_element_type=jnp.float32)
    t = t.astype(jnp.bfloat16)
    # interpolate along H: (Hout, H) @ (rb, H, Wout) -> (rb, Hout, Wout)
    o = jnp.einsum("roh,rhv->rov", wy_b, t, preferred_element_type=jnp.float32)
    o_ref[...] = o


def _decoder_kernel(q0_ref, f_ref, lw_ref, wcls_ref, bcls_ref,
                    mask_ref, logit_ref, dec_ref, *, scale, num_layers):
    # q0_ref:   (Q, E)              f32  shared query embedding
    # f_ref:    (1, E, S)           bf16 mask feature for this batch element
    # lw_ref:   (L, E, E)           bf16 stacked per-layer projection weights
    # wcls_ref: (E, NCp)            bf16 class head weight, padded to 128 lanes
    # bcls_ref: (1, NCp)            f32  class head bias, padded to 128 lanes
    # mask_ref: (1, (L+1)*Q, S)     f32  per-layer mask predictions (stacked on rows)
    # logit_ref:(1, (L+1)*Q, NCp)   f32  per-layer class logits (stacked on rows)
    # dec_ref:  (1, (L+1)*Q, E)     f32  per-layer query states (stacked on rows)
    f_bf = f_ref[0]                      # (E, S), resident for all layers
    L = num_layers
    Q = q0_ref.shape[0]

    q = q0_ref[...]                      # (Q, E) f32 running query state
    # L is a small static constant -> fully unrolled loop, everything stays in
    # VMEM / vregs for the whole sweep.  One q @ f matmul per step, reused for
    # both the mask prediction and the (scaled) attention softmax.
    for l in range(L + 1):
        q_bf = q.astype(jnp.bfloat16)
        scores = jnp.dot(q_bf, f_bf, preferred_element_type=jnp.float32)   # (Q, S)
        mask_ref[0, pl.ds(l * Q, Q), :] = scores
        dec_ref[0, pl.ds(l * Q, Q), :] = q
        if l < L:
            s = scores * scale
            s_max = jnp.max(s, axis=-1, keepdims=True)
            p = jnp.exp(s - s_max)
            p = p * pl.reciprocal(jnp.sum(p, axis=-1, keepdims=True), approx=True)
            # attn = p @ f^T : contract S of p (Q,S) with S of f (E,S) -> (Q, E)
            attn = lax.dot_general(p.astype(jnp.bfloat16), f_bf,
                                   dimension_numbers=(((1,), (1,)), ((), ())),
                                   preferred_element_type=jnp.float32)
            q = q + jnp.dot(attn.astype(jnp.bfloat16), lw_ref[l],
                            preferred_element_type=jnp.float32)

    # Batched class head: read back all L+1 query states from the VMEM-resident
    # dec output block and do ONE ((L+1)*Q, E) @ (E, NCp) matmul + bias.
    q_all = dec_ref[0].astype(jnp.bfloat16)                                # (LQ, E)
    logit_ref[0] = (jnp.dot(q_all, wcls_ref[...], preferred_element_type=jnp.float32)
                    + bcls_ref[...])


# -----------------------------------------------------------------------------
# Host-side helpers
# -----------------------------------------------------------------------------
def _interp_matrix_np(out_size, in_size):
    """Bilinear interpolation matrix (align_corners=True), shape (out, in)."""
    m = np.zeros((out_size, in_size), dtype=np.float32)
    if out_size == 1:
        src = np.zeros((1,), dtype=np.float64)
    else:
        src = np.arange(out_size, dtype=np.float64) * (in_size - 1) / (out_size - 1)
    low = np.clip(np.floor(src).astype(np.int64), 0, in_size - 1)
    high = np.clip(low + 1, 0, in_size - 1)
    w_high = (src - low).astype(np.float32)
    w_low = 1.0 - w_high
    rows = np.arange(out_size)
    m[rows, low] += w_low
    m[rows, high] += w_high       # low == high at the boundary -> weights still sum to 1
    return m


def _tensorcores_per_chip():
    # Only v7x has 2 TensorCores per chip; v5e/v6e grids are a sequential loop,
    # so splitting the row axis just adds per-step pipeline overhead there.
    try:
        kind = jax.devices()[0].device_kind.lower()
    except Exception:
        return 1
    return 2 if "v7" in kind else 1


class INSDecoderBasePallas:
    def __init__(self, decoder_ids=(5,), tgt_shape=None, params=None):
        self.decoder_ids = tuple(decoder_ids)
        self.tgt_shape = None if tgt_shape is None else tuple(tgt_shape)
        self.params = params
        self._interp_cache = {}   # (in_hw, out_hw) -> (wxT bf16 (W,Wout), wy bf16 (Hout,H))
        self._num_cores = _tensorcores_per_chip()

        if params is not None:
            E, NC = params["w_cls"].shape
            self._num_classes = int(NC)
            ncp = ((NC + 127) // 128) * 128           # pad class dim to lane width
            self._w_cls_pad = jnp.zeros((E, ncp), jnp.bfloat16).at[:, :NC].set(
                jnp.asarray(params["w_cls"], jnp.bfloat16))
            self._b_cls_pad = jnp.zeros((1, ncp), jnp.float32).at[:, :NC].set(
                jnp.asarray(params["b_cls"], jnp.float32).reshape(1, NC))
            self._layer_ws = jnp.stack(
                [jnp.asarray(w, jnp.bfloat16) for w in params["layer_ws"]], axis=0)
            self._query_embed = jnp.asarray(params["query_embed"], jnp.float32)

    # ---------------- up-sample ----------------
    def _get_interp_weights(self, in_hw, out_hw):
        key = (in_hw, out_hw)
        if key not in self._interp_cache:
            wy = _interp_matrix_np(out_hw[0], in_hw[0])       # (Hout, H)
            wx = _interp_matrix_np(out_hw[1], in_hw[1])       # (Wout, W)
            self._interp_cache[key] = (
                jnp.asarray(wx.T, jnp.bfloat16),              # (W, Wout)
                jnp.asarray(wy, jnp.bfloat16),                # (Hout, H)
            )
        return self._interp_cache[key]

    def up_sample(self, x, tgt_shape=None):
        tgt_shape = self.tgt_shape if tgt_shape is None else tuple(tgt_shape)
        if tuple(x.shape[-2:]) == tuple(tgt_shape):
            return x
        return self._bilinear_upsample(x, tgt_shape)

    def _bilinear_upsample(self, x, tgt_shape):
        B, C, H, W = x.shape
        Hout, Wout = tgt_shape
        wxT, wy = self._get_interp_weights((H, W), (Hout, Wout))
        N = B * C
        x3 = x.reshape(N, H, W).astype(jnp.bfloat16)

        # Split rows across TensorCores only on multi-core (v7x) chips.
        if self._num_cores >= 2 and N % 2 == 0:
            nblk = 2
        else:
            nblk = 1
        rb = N // nblk

        cost = pl.CostEstimate(
            flops=2 * N * H * W * Wout + 2 * N * Hout * H * Wout,
            transcendentals=0,
            bytes_accessed=(x3.size * 2 + (wxT.size + wy.size) * 2
                            + N * Hout * Wout * 4),
        )
        out = pl.pallas_call(
            _upsample_kernel,
            out_shape=jax.ShapeDtypeStruct((N, Hout, Wout), jnp.float32),
            grid=(nblk,),
            in_specs=[
                pl.BlockSpec((rb, H, W), lambda i: (i, 0, 0)),
                pl.BlockSpec((W, Wout), lambda i: (0, 0)),
                pl.BlockSpec((Hout, H), lambda i: (0, 0)),
            ],
            out_specs=pl.BlockSpec((rb, Hout, Wout), lambda i: (i, 0, 0)),
            compiler_params=pltpu.CompilerParams(dimension_semantics=("parallel",)),
            cost_estimate=cost,
        )(x3, wxT, wy)
        return out.reshape(B, C, Hout, Wout)

    # ---------------- synthetic bev decoder (fused) ----------------
    def _bev_decoder(self, ms_features, mask_feature):
        del ms_features  # the synthetic decoder only uses the mask_feature map
        B, E, H, W = mask_feature.shape
        S = H * W
        Q = self._query_embed.shape[0]
        L = int(self._layer_ws.shape[0])
        NCp = self._w_cls_pad.shape[1]
        LQ = (L + 1) * Q

        # keep (B, E, S) layout: plain reshape, no transpose / extra HBM round trip;
        # activations travel to VMEM as bf16 (f32 accumulation inside the kernel).
        f = mask_feature.reshape(B, E, S).astype(jnp.bfloat16)

        kern = functools.partial(_decoder_kernel,
                                 scale=1.0 / float(E) ** 0.5, num_layers=L)

        flops_per_b = (2 * Q * E * S * (L + 1)      # score matmuls
                       + 2 * Q * S * E * L          # attn @ f^T
                       + 2 * Q * E * E * L          # per-layer projection
                       + 2 * LQ * E * NCp)          # batched class head
        cost = pl.CostEstimate(
            flops=B * flops_per_b,
            transcendentals=B * L * Q * S,
            bytes_accessed=(Q * E * 4 + B * E * S * 2 + L * E * E * 2
                            + E * NCp * 2 + NCp * 4
                            + B * LQ * S * 4 + B * LQ * NCp * 4 + B * LQ * E * 4),
        )

        masks, logits_pad, dec = pl.pallas_call(
            kern,
            out_shape=(
                jax.ShapeDtypeStruct((B, LQ, S), jnp.float32),
                jax.ShapeDtypeStruct((B, LQ, NCp), jnp.float32),
                jax.ShapeDtypeStruct((B, LQ, E), jnp.float32),
            ),
            grid=(B,),
            in_specs=[
                pl.BlockSpec((Q, E), lambda b: (0, 0)),          # query embed (f32)
                pl.BlockSpec((1, E, S), lambda b: (b, 0, 0)),    # mask feature (bf16)
                pl.BlockSpec((L, E, E), lambda b: (0, 0, 0)),    # layer weights (bf16)
                pl.BlockSpec((E, NCp), lambda b: (0, 0)),        # class head W (bf16)
                pl.BlockSpec((1, NCp), lambda b: (0, 0)),        # class head b (f32)
            ],
            out_specs=(
                pl.BlockSpec((1, LQ, S), lambda b: (b, 0, 0)),
                pl.BlockSpec((1, LQ, NCp), lambda b: (b, 0, 0)),
                pl.BlockSpec((1, LQ, E), lambda b: (b, 0, 0)),
            ),
            compiler_params=pltpu.CompilerParams(dimension_semantics=("parallel",)),
            cost_estimate=cost,
        )(self._query_embed, f, self._layer_ws, self._w_cls_pad, self._b_cls_pad)

        nc = self._num_classes
        pred_masks = [masks[:, l * Q:(l + 1) * Q, :].reshape(B, Q, H, W)
                      for l in range(L + 1)]
        pred_logits = [logits_pad[:, l * Q:(l + 1) * Q, :nc] for l in range(L + 1)]
        decoder_outputs = [dec[:, l * Q:(l + 1) * Q, :] for l in range(L + 1)]
        return {"pred_masks": pred_masks, "pred_logits": pred_logits,
                "decoder_outputs": decoder_outputs}

    # ---------------- forward ----------------
    def forward(self, inputs):
        assert "bev_enc_features" in inputs
        bev_enc_features = inputs["bev_enc_features"]
        if self.tgt_shape is not None:
            bev_enc_features = [self.up_sample(x) for x in inputs["bev_enc_features"]]
        out = self._bev_decoder(bev_enc_features[-1:], bev_enc_features[-1])
        return {
            "mask_features": [out["pred_masks"][1:][i] for i in self.decoder_ids],
            "obj_scores": [out["pred_logits"][1:][i] for i in self.decoder_ids],
            "decoder_outputs": [out["decoder_outputs"][1:][i] for i in self.decoder_ids],
            "bev_enc_features": bev_enc_features,
        }


# -----------------------------------------------------------------------------
# Deterministic parameter construction + smoke test
# -----------------------------------------------------------------------------
def make_params(key, embed_dim, num_queries, num_classes, num_layers):
    ks = jax.random.split(key, 3 + num_layers)
    return {
        "query_embed": 0.1 * jax.random.normal(ks[0], (num_queries, embed_dim), jnp.float32),
        "w_cls": 0.1 * jax.random.normal(ks[1], (embed_dim, num_classes), jnp.float32),
        "b_cls": 0.1 * jax.random.normal(ks[2], (1, num_classes), jnp.float32),
        "layer_ws": [0.1 * jax.random.normal(ks[3 + i], (embed_dim, embed_dim), jnp.float32)
                     for i in range(num_layers)],
    }


if __name__ == "__main__":
    B, C, Hin, Win = 2, 32, 8, 8
    tgt_shape = (16, 16)
    num_queries, num_classes, num_layers = 8, 4, 6

    root = jax.random.PRNGKey(0)
    k_feat0, k_feat1, k_par = jax.random.split(root, 3)
    bev_enc_features = [
        jax.random.normal(k_feat0, (B, C, Hin, Win), jnp.float32),
        jax.random.normal(k_feat1, (B, C, Hin, Win), jnp.float32),
    ]
    params = make_params(k_par, embed_dim=C, num_queries=num_queries,
                         num_classes=num_classes, num_layers=num_layers)

    module = INSDecoderBasePallas(decoder_ids=(5,), tgt_shape=tgt_shape, params=params)
    out = module.forward({"bev_enc_features": bev_enc_features})

    jax.block_until_ready(out["mask_features"][0])
    jax.block_until_ready(out["obj_scores"][0])
    jax.block_until_ready(out["decoder_outputs"][0])
    jax.block_until_ready(out["bev_enc_features"][-1])

    assert out["mask_features"][0].shape == (B, num_queries, tgt_shape[0], tgt_shape[1])
    assert out["obj_scores"][0].shape == (B, num_queries, num_classes)
    assert out["decoder_outputs"][0].shape == (B, num_queries, C)
    assert out["bev_enc_features"][-1].shape == (B, C, tgt_shape[0], tgt_shape[1])
    assert all(jnp.isfinite(x).all() for x in (out["mask_features"][0],
                                               out["obj_scores"][0],
                                               out["decoder_outputs"][0],
                                               out["bev_enc_features"][-1]))

    print("KERNEL_OK")
</pallas_src>

<mosaic_0001>
module attributes {stable_mosaic.version = 11 : i64} {
  func.func @_upsample_kernel(%arg0: i32, %arg1: memref<64x8x8xbf16, #tpu.memory_space<vmem>>, %arg2: memref<8x16xbf16, #tpu.memory_space<vmem>>, %arg3: memref<16x8xbf16, #tpu.memory_space<vmem>>, %arg4: memref<64x16x16xf32, #tpu.memory_space<vmem>>) attributes {dimension_semantics = [#tpu.dimension_semantics<parallel>], iteration_bounds = array<i64: 1>, scalar_prefetch = 0 : i64, scratch_operands = 0 : i64, tpu.core_type = #tpu.core_type<tc>, window_params = [{transform_indices = @transform_0, window_bounds = array<i64: 64, 8, 8>}, {pipeline_mode = #tpu.pipeline_mode<synchronous>, transform_indices = @transform_1, window_bounds = array<i64: 8, 16>}, {pipeline_mode = #tpu.pipeline_mode<synchronous>, transform_indices = @transform_2, window_bounds = array<i64: 16, 8>}, {transform_indices = @transform_3, window_bounds = array<i64: 64, 16, 16>}]} {
    %c0 = arith.constant 0 : index
    %c0_0 = arith.constant 0 : index
    %c0_1 = arith.constant 0 : index
    %0 = vector.load %arg1[%c0, %c0_0, %c0_1] : memref<64x8x8xbf16, #tpu.memory_space<vmem>>, vector<64x8x8xbf16>
    %c0_2 = arith.constant 0 : index
    %c0_3 = arith.constant 0 : index
    %1 = vector.load %arg2[%c0_2, %c0_3] : memref<8x16xbf16, #tpu.memory_space<vmem>>, vector<8x16xbf16>
    %2 = vector.shape_cast %1 : vector<8x16xbf16> to vector<1x8x16xbf16>
    %3 = vector.broadcast %2 : vector<1x8x16xbf16> to vector<64x8x16xbf16>
    %c0_4 = arith.constant 0 : index
    %c0_5 = arith.constant 0 : index
    %4 = vector.load %arg3[%c0_4, %c0_5] : memref<16x8xbf16, #tpu.memory_space<vmem>>, vector<16x8xbf16>
    %5 = vector.shape_cast %4 : vector<16x8xbf16> to vector<1x16x8xbf16>
    %6 = vector.broadcast %5 : vector<1x16x8xbf16> to vector<64x16x8xbf16>
    "tpu.trace_start"() <{level = 10 : i32, message = "rhw,rwv->rhv"}> : () -> ()
    %cst = arith.constant dense<0.000000e+00> : vector<64x8x16xf32>
    %7 = tpu.matmul %0, %3, %cst {dimension_numbers = #tpu.dot_dimension_numbers<[2], [1], [1], [2], [0, 0, 0, 1, 1, 2], [0], [0]>} : vector<64x8x8xbf16>, vector<64x8x16xbf16>, vector<64x8x16xf32> -> vector<64x8x16xf32>
    "tpu.trace_stop"() : () -> ()
    %8 = arith.truncf %7 : vector<64x8x16xf32> to vector<64x8x16xbf16>
    "tpu.trace_start"() <{level = 10 : i32, message = "roh,rhv->rov"}> : () -> ()
    %cst_6 = arith.constant dense<0.000000e+00> : vector<64x16x16xf32>
    %9 = tpu.matmul %6, %8, %cst_6 {dimension_numbers = #tpu.dot_dimension_numbers<[2], [1], [1], [2], [0, 0, 0, 1, 1, 2], [0], [0]>} : vector<64x16x8xbf16>, vector<64x8x16xbf16>, vector<64x16x16xf32> -> vector<64x16x16xf32>
    "tpu.trace_stop"() : () -> ()
    %c0_7 = arith.constant 0 : index
    %c0_8 = arith.constant 0 : index
    %c0_9 = arith.constant 0 : index
    %10 = vector.load %arg4[%c0_7, %c0_8, %c0_9] : memref<64x16x16xf32, #tpu.memory_space<vmem>>, vector<64x16x16xf32>
    tpu.vector_store %arg4[%c0_7, %c0_8, %c0_9], %9 {strides = array<i32>} : memref<64x16x16xf32, #tpu.memory_space<vmem>>, vector<64x16x16xf32>,
    return
  }
  func.func @transform_0(%arg0: i32) -> (i32, i32, i32) {
    %c0_i32 = arith.constant 0 : i32
    %c0_i32_0 = arith.constant 0 : i32
    %c0_i32_1 = arith.constant 0 : i32
    return %arg0, %c0_i32, %c0_i32_0 : i32, i32, i32
  }
  func.func @transform_1(%arg0: i32) -> (i32, i32) {
    %c0_i32 = arith.constant 0 : i32
    %c0_i32_0 = arith.constant 0 : i32
    %c0_i32_1 = arith.constant 0 : i32
    return %c0_i32, %c0_i32_0 : i32, i32
  }
  func.func @transform_2(%arg0: i32) -> (i32, i32) {
    %c0_i32 = arith.constant 0 : i32
    %c0_i32_0 = arith.constant 0 : i32
    %c0_i32_1 = arith.constant 0 : i32
    return %c0_i32, %c0_i32_0 : i32, i32
  }
  func.func @transform_3(%arg0: i32) -> (i32, i32, i32) {
    %c0_i32 = arith.constant 0 : i32
    %c0_i32_0 = arith.constant 0 : i32
    %c0_i32_1 = arith.constant 0 : i32
    return %arg0, %c0_i32, %c0_i32_0 : i32, i32, i32
  }
}

</mosaic_0001>

<bundles_post_ra>
// kernel: tpu_custom_call.1
= control target key start
LH: loop header
LB: loop body
LE: loop exit
PB: predicated region body
PF: predicated region fallthrough
CT: control target
= control target key end

     0   :  { %vm86_vm0 = vcmask 1043456   ;;  %v7017_v0 = vmov 0.0   ;;  %vm7018_vm1 = vmmov 0   ;;  %vm82_vm2 = vcmask 64512   ;;  %s8719_s1 = inlined_call_operand.vmem [shape: bf16[8,16], index: 1, kind: input, shape index: {}]   ;;  %s8720_s0 = inlined_call_operand.vmem [shape: bf16[64,8,8], index: 0, kind: input, shape index: {}]   ;;  %s8721_s2 = inlined_call_operand.vmem [shape: bf16[16,8], index: 2, kind: input, shape index: {}]   ;;  %s8722_s3 = inlined_call_operand.vmem [shape: f32[64,16,16], index: 3, kind: output, shape index: {}]  }
   0x1   :  { %6245 = vmatprep.subr.bf16.mxu0 %v7017_v0  ;;  %6251 = vmatprep.subr.bf16.mxu1 %v7017_v0  ;;  %v79_v1 = vld [vmem:[%s8719_s1] sm:$0xf]  ;;  %v16_v4 = vld [vmem:[%s8720_s0 + $0x4] sm:$0xf]  ;;  %v17_v5 = vld [vmem:[%s8720_s0 + $0x8] sm:$0xf] }
   0x2   :  { %v7045_v2 = vsel %vm86_vm0, %v79_v1, 0  ;;  %6247 = vmatprep.mubr.msk.bf16.mxu0 %vm7018_vm1, %v7017_v0  ;;  %6253 = vmatprep.mubr.msk.bf16.mxu1 %vm7018_vm1, %v7017_v0  ;;  %v15_v3 = vld [vmem:[%s8720_s0] sm:$0xf]  ;;  %v18_v6 = vld [vmem:[%s8720_s0 + $0xc] sm:$0xf]  ;;  %vm5727_vm3 = vcmask 130048  }
   0x3   :  { %6246 = vmatpush3.bf16.msra.mxu0 %v7045_v2  ;;  %6252 = vmatpush3.bf16.msra.mxu1 %v7045_v2  ;;  %v19_v7 = vld [vmem:[%s8720_s0 + $0x10] sm:$0xf]  ;;  %v20_v8 = vld [vmem:[%s8720_s0 + $0x14] sm:$0xf]  ;;  %v21_v9 = vld [vmem:[%s8720_s0 + $0x18] sm:$0xf] }
   0x4   :  { %6257 = vmatprep.subr.bf16.mxu0 %v7017_v0  ;;  %6263 = vmatprep.subr.bf16.mxu1 %v7017_v0  ;;  %v22_v10 = vld [vmem:[%s8720_s0 + $0x1c] sm:$0xf]  ;;  %v23_v11 = vld [vmem:[%s8720_s0 + $0x20] sm:$0xf]  ;;  %v24_v12 = vld [vmem:[%s8720_s0 + $0x24] sm:$0xf] }
   0x5   :  { %v25_v13 = vld [vmem:[%s8720_s0 + $0x28] sm:$0xf]  ;;  %v26_v14 = vld [vmem:[%s8720_s0 + $0x2c] sm:$0xf]  ;;  %v27_v15 = vld [vmem:[%s8720_s0 + $0x30] sm:$0xf] }
   0x6   :  { %6248 = vmatmul.mubr.msk.bf16.vlgmr.msra.gmra.mxu0 %vm82_vm2, %v15_v3  ;;  %6254 = vmatmul.mubr.msk.bf16.vlgmr.msra.gmra.mxu1 %vm82_vm2, %v16_v4  ;;  %v28_v16 = vld [vmem:[%s8720_s0 + $0x34] sm:$0xf]  ;;  %v29_v17 = vld [vmem:[%s8720_s0 + $0x38] sm:$0xf]  ;;  %v30_v18 = vld [vmem:[%s8720_s0 + $0x3c] sm:$0xf] }
   0x7   :  { %6258 = vmatpush3.bf16.msra.mxu0 %v7045_v2  ;;  %6264 = vmatpush3.bf16.msra.mxu1 %v7045_v2  ;;  %v31_v19 = vld [vmem:[%s8720_s0 + $0x40] sm:$0xf]  ;;  %v32_v20 = vld [vmem:[%s8720_s0 + $0x44] sm:$0xf]  ;;  %v33_v21 = vld [vmem:[%s8720_s0 + $0x48] sm:$0xf] }
   0x8   :  { %6259 = vmatprep.mubr.msk.bf16.mxu0 %vm7018_vm1, %v7017_v0  ;;  %6265 = vmatprep.mubr.msk.bf16.mxu1 %vm7018_vm1, %v7017_v0  ;;  %v34_v22 = vld [vmem:[%s8720_s0 + $0x4c] sm:$0xf]  ;;  %v35_v23 = vld [vmem:[%s8720_s0 + $0x50] sm:$0xf]  ;;  %v36_v24 = vld [vmem:[%s8720_s0 + $0x54] sm:$0xf] }
   0x9   :  { %6269 = vmatprep.subr.bf16.mxu0 %v7017_v0  ;;  %6275 = vmatprep.subr.bf16.mxu1 %v7017_v0  ;;  %v37_v25 = vld [vmem:[%s8720_s0 + $0x58] sm:$0xf]  ;;  %v38_v26 = vld [vmem:[%s8720_s0 + $0x5c] sm:$0xf]  ;;  %v39_v27 = vld [vmem:[%s8720_s0 + $0x60] sm:$0xf] }
   0xa   :  { %v40_v28 = vld [vmem:[%s8720_s0 + $0x64] sm:$0xf]  ;;  %v41_v29 = vld [vmem:[%s8720_s0 + $0x68] sm:$0xf]  ;;  %v42_v30 = vld [vmem:[%s8720_s0 + $0x6c] sm:$0xf] }
   0xb   :  { %v43_v31 = vld [vmem:[%s8720_s0 + $0x70] sm:$0xf]  ;;  %v44_v32 = vld [vmem:[%s8720_s0 + $0x74] sm:$0xf]  ;;  %v45_v33 = vld [vmem:[%s8720_s0 + $0x78] sm:$0xf] }
   0xc   :  { %v46_v34 = vld [vmem:[%s8720_s0 + $0x7c] sm:$0xf]  ;;  %v47_v35 = vld [vmem:[%s8720_s0 + $0x80] sm:$0xf]  ;;  %v48_v36 = vld [vmem:[%s8720_s0 + $0x84] sm:$0xf] }
   0xd   :  { %v49_v37 = vld [vmem:[%s8720_s0 + $0x88] sm:$0xf]  ;;  %v50_v38 = vld [vmem:[%s8720_s0 + $0x8c] sm:$0xf]  ;;  %v51_v39 = vld [vmem:[%s8720_s0 + $0x90] sm:$0xf] }
   0xe   :  { %6260 = vmatmul.mubr.msk.bf16.vlgmr.msra.gmra.mxu0 %vm82_vm2, %v17_v5  ;;  %6266 = vmatmul.mubr.msk.bf16.vlgmr.msra.gmra.mxu1 %vm82_vm2, %v18_v6  ;;  %v52_v40 = vld [vmem:[%s8720_s0 + $0x94] sm:$0xf]  ;;  %v53_v41 = vld [vmem:[%s8720_s0 + $0x98] sm:$0xf]  ;;  %v54_v42 = vld [vmem:[%s8720_s0 + $0x9c] sm:$0xf] }
   0xf   :  { %6270 = vmatpush3.bf16.msra.mxu0 %v7045_v2  ;;  %6276 = vmatpush3.bf16.msra.mxu1 %v7045_v2  ;;  %v55_v43 = vld [vmem:[%s8720_s0 + $0xa0] sm:$0xf]  ;;  %v56_v44 = vld [vmem:[%s8720_s0 + $0xa4] sm:$0xf]  ;;  %v57_v45 = vld [vmem:[%s8720_s0 + $0xa8] sm:$0xf] }
  0x10   :  { %6271 = vmatprep.mubr.msk.bf16.mxu0 %vm7018_vm1, %v7017_v0  ;;  %6277 = vmatprep.mubr.msk.bf16.mxu1 %vm7018_vm1, %v7017_v0  ;;  %v58_v46 = vld [vmem:[%s8720_s0 + $0xac] sm:$0xf]  ;;  %v59_v47 = vld [vmem:[%s8720_s0 + $0xb0] sm:$0xf]  ;;  %v60_v48 = vld [vmem:[%s8720_s0 + $0xb4] sm:$0xf] }
  0x11   :  { %6281 = vmatprep.subr.bf16.mxu0 %v7017_v0  ;;  %6287 = vmatprep.subr.bf16.mxu1 %v7017_v0  ;;  %v61_v49 = vld [vmem:[%s8720_s0 + $0xb8] sm:$0xf]  ;;  %v62_v50 = vld [vmem:[%s8720_s0 + $0xbc] sm:$0xf]  ;;  %v63_v51 = vld [vmem:[%s8720_s0 + $0xc0] sm:$0xf] }
  0x12   :  { %v64_v52 = vld [vmem:[%s8720_s0 + $0xc4] sm:$0xf]  ;;  %v65_v59 = vld [vmem:[%s8720_s0 + $0xc8] sm:$0xf]  ;;  %v66_v60 = vld [vmem:[%s8720_s0 + $0xcc] sm:$0xf] }
  0x16   :  { %6272 = vmatmul.mubr.msk.bf16.vlgmr.msra.gmra.mxu0 %vm82_vm2, %v19_v7  ;;  %6278 = vmatmul.mubr.msk.bf16.vlgmr.msra.gmra.mxu1 %vm82_vm2, %v20_v8  ;;  %v67_v7 = vld [vmem:[%s8720_s0 + $0xd0] sm:$0xf]  ;;  %v68_v8 = vld [vmem:[%s8720_s0 + $0xd4] sm:$0xf] }
  0x17   :  { %6282 = vmatpush3.bf16.msra.mxu0 %v7045_v2  ;;  %6288 = vmatpush3.bf16.msra.mxu1 %v7045_v2 }
  0x18   :  { %6283 = vmatprep.mubr.msk.bf16.mxu0 %vm7018_vm1, %v7017_v0  ;;  %6289 = vmatprep.mubr.msk.bf16.mxu1 %vm7018_vm1, %v7017_v0 }
  0x19   :  { %6293 = vmatprep.subr.bf16.mxu0 %v7017_v0  ;;  %6299 = vmatprep.subr.bf16.mxu1 %v7017_v0 }
  0x1e   :  { %6284 = vmatmul.mubr.msk.bf16.vlgmr.msra.gmra.mxu0 %vm82_vm2, %v21_v9  ;;  %6290 = vmatmul.mubr.msk.bf16.vlgmr.msra.gmra.mxu1 %vm82_vm2, %v22_v10 }
  0x1f   :  { %6294 = vmatpush3.bf16.msra.mxu0 %v7045_v2  ;;  %6300 = vmatpush3.bf16.msra.mxu1 %v7045_v2 }
  0x20   :  { %6295 = vmatprep.mubr.msk.bf16.mxu0 %vm7018_vm1, %v7017_v0  ;;  %6301 = vmatprep.mubr.msk.bf16.mxu1 %vm7018_vm1, %v7017_v0 }
  0x21   :  { %6305 = vmatprep.subr.bf16.mxu0 %v7017_v0  ;;  %6311 = vmatprep.subr.bf16.mxu1 %v7017_v0 }
  0x26   :  { %6296 = vmatmul.mubr.msk.bf16.vlgmr.msra.gmra.mxu0 %vm82_vm2, %v23_v11  ;;  %6302 = vmatmul.mubr.msk.bf16.vlgmr.msra.gmra.mxu1 %vm82_vm2, %v24_v12 }
  0x27   :  { %6306 = vmatpush3.bf16.msra.mxu0 %v7045_v2  ;;  %6312 = vmatpush3.bf16.msra.mxu1 %v7045_v2 }
  0x28   :  { %6307 = vmatprep.mubr.msk.bf16.mxu0 %vm7018_vm1, %v7017_v0  ;;  %6313 = vmatprep.mubr.msk.bf16.mxu1 %vm7018_vm1, %v7017_v0 }
  0x29   :  { %6317 = vmatprep.subr.bf16.mxu0 %v7017_v0  ;;  %6323 = vmatprep.subr.bf16.mxu1 %v7017_v0 }
  0x2e   :  { %6308 = vmatmul.mubr.msk.bf16.vlgmr.msra.gmra.mxu0 %vm82_vm2, %v25_v13  ;;  %6314 = vmatmul.mubr.msk.bf16.vlgmr.msra.gmra.mxu1 %vm82_vm2, %v26_v14 }
  0x2f   :  { %6318 = vmatpush3.bf16.msra.mxu0 %v7045_v2  ;;  %6324 = vmatpush3.bf16.msra.mxu1 %v7045_v2 }
  0x30   :  { %6319 = vmatprep.mubr.msk.bf16.mxu0 %vm7018_vm1, %v7017_v0  ;;  %6325 = vmatprep.mubr.msk.bf16.mxu1 %vm7018_vm1, %v7017_v0 }
  0x31   :  { %6329 = vmatprep.subr.bf16.mxu0 %v7017_v0  ;;  %6335 = vmatprep.subr.bf16.mxu1 %v7017_v0 }
  0x36   :  { %6320 = vmatmul.mubr.msk.bf16.vlgmr.msra.gmra.mxu0 %vm82_vm2, %v27_v15  ;;  %6326 = vmatmul.mubr.msk.bf16.vlgmr.msra.gmra.mxu1 %vm82_vm2, %v28_v16 }
  0x37   :  { %6330 = vmatpush3.bf16.msra.mxu0 %v7045_v2  ;;  %6336 = vmatpush3.bf16.msra.mxu1 %v7045_v2 }
  0x38   :  { %6331 = vmatprep.mubr.msk.bf16.mxu0 %vm7018_vm1, %v7017_v0  ;;  %6337 = vmatprep.mubr.msk.bf16.mxu1 %vm7018_vm1, %v7017_v0 }
  0x39   :  { %6341 = vmatprep.subr.bf16.mxu0 %v7017_v0  ;;  %6347 = vmatprep.subr.bf16.mxu1 %v7017_v0 }
  0x3e   :  { %6332 = vmatmul.mubr.msk.bf16.vlgmr.msra.gmra.mxu0 %vm82_vm2, %v29_v17  ;;  %6338 = vmatmul.mubr.msk.bf16.vlgmr.msra.gmra.mxu1 %vm82_vm2, %v30_v18  ;;  %v69_v17 = vld [vmem:[%s8720_s0 + $0xd8] sm:$0xf]  ;;  %v70_v18 = vld [vmem:[%s8720_s0 + $0xdc] sm:$0xf] }
  0x3f   :  { %6342 = vmatpush3.bf16.msra.mxu0 %v7045_v2  ;;  %6348 = vmatpush3.bf16.msra.mxu1 %v7045_v2 }
  0x40   :  { %6343 = vmatprep.mubr.msk.bf16.mxu0 %vm7018_vm1, %v7017_v0  ;;  %6349 = vmatprep.mubr.msk.bf16.mxu1 %vm7018_vm1, %v7017_v0 }
  0x41   :  { %6353 = vmatprep.subr.bf16.mxu0 %v7017_v0  ;;  %6359 = vmatprep.subr.bf16.mxu1 %v7017_v0 }
  0x46   :  { %6344 = vmatmul.mubr.msk.bf16.vlgmr.msra.gmra.mxu0 %vm82_vm2, %v31_v19  ;;  %6350 = vmatmul.mubr.msk.bf16.vlgmr.msra.gmra.mxu1 %vm82_vm2, %v32_v20 }
  0x47   :  { %6354 = vmatpush3.bf16.msra.mxu0 %v7045_v2  ;;  %6360 = vmatpush3.bf16.msra.mxu1 %v7045_v2 }
  0x48   :  { %6355 = vmatprep.mubr.msk.bf16.mxu0 %vm7018_vm1, %v7017_v0  ;;  %6361 = vmatprep.mubr.msk.bf16.mxu1 %vm7018_vm1, %v7017_v0 }
  0x49   :  { %6365 = vmatprep.subr.bf16.mxu0 %v7017_v0  ;;  %6371 = vmatprep.subr.bf16.mxu1 %v7017_v0 }
  0x4e   :  { %6356 = vmatmul.mubr.msk.bf16.vlgmr.msra.gmra.mxu0 %vm82_vm2, %v33_v21  ;;  %6362 = vmatmul.mubr.msk.bf16.vlgmr.msra.gmra.mxu1 %vm82_vm2, %v34_v22 }
  0x4f   :  { %6366 = vmatpush3.bf16.msra.mxu0 %v7045_v2  ;;  %6372 = vmatpush3.bf16.msra.mxu1 %v7045_v2 }
  0x50   :  { %6367 = vmatprep.mubr.msk.bf16.mxu0 %vm7018_vm1, %v7017_v0  ;;  %6373 = vmatprep.mubr.msk.bf16.mxu1 %vm7018_vm1, %v7017_v0 }
  0x51   :  { %6377 = vmatprep.subr.bf16.mxu0 %v7017_v0  ;;  %6383 = vmatprep.subr.bf16.mxu1 %v7017_v0 }
  0x56   :  { %6368 = vmatmul.mubr.msk.bf16.vlgmr.msra.gmra.mxu0 %vm82_vm2, %v35_v23  ;;  %6374 = vmatmul.mubr.msk.bf16.vlgmr.msra.gmra.mxu1 %vm82_vm2, %v36_v24 }
  0x57   :  { %6378 = vmatpush3.bf16.msra.mxu0 %v7045_v2  ;;  %6384 = vmatpush3.bf16.msra.mxu1 %v7045_v2 }
  0x58   :  { %6379 = vmatprep.mubr.msk.bf16.mxu0 %vm7018_vm1, %v7017_v0  ;;  %6385 = vmatprep.mubr.msk.bf16.mxu1 %vm7018_vm1, %v7017_v0 }
  0x59   :  { %6389 = vmatprep.subr.bf16.mxu0 %v7017_v0  ;;  %6395 = vmatprep.subr.bf16.mxu1 %v7017_v0 }
  0x5e   :  { %6380 = vmatmul.mubr.msk.bf16.vlgmr.msra.gmra.mxu0 %vm82_vm2, %v37_v25  ;;  %6386 = vmatmul.mubr.msk.bf16.vlgmr.msra.gmra.mxu1 %vm82_vm2, %v38_v26 }
  0x5f   :  { %6390 = vmatpush3.bf16.msra.mxu0 %v7045_v2  ;;  %6396 = vmatpush3.bf16.msra.mxu1 %v7045_v2 }
  0x60   :  { %6391 = vmatprep.mubr.msk.bf16.mxu0 %vm7018_vm1, %v7017_v0  ;;  %6397 = vmatprep.mubr.msk.bf16.mxu1 %vm7018_vm1, %v7017_v0 }
  0x61   :  { %6401 = vmatprep.subr.bf16.mxu0 %v7017_v0  ;;  %6407 = vmatprep.subr.bf16.mxu1 %v7017_v0 }
  0x66   :  { %6392 = vmatmul.mubr.msk.bf16.vlgmr.msra.gmra.mxu0 %vm82_vm2, %v39_v27  ;;  %6398 = vmatmul.mubr.msk.bf16.vlgmr.msra.gmra.mxu1 %vm82_vm2, %v40_v28  ;;  %v71_v27 = vld [vmem:[%s8720_s0 + $0xe0] sm:$0xf]  ;;  %v72_v28 = vld [vmem:[%s8720_s0 + $0xe4] sm:$0xf] }
  0x67   :  { %6402 = vmatpush3.bf16.msra.mxu0 %v7045_v2  ;;  %6408 = vmatpush3.bf16.msra.mxu1 %v7045_v2 }
  0x68   :  { %6403 = vmatprep.mubr.msk.bf16.mxu0 %vm7018_vm1, %v7017_v0  ;;  %6409 = vmatprep.mubr.msk.bf16.mxu1 %vm7018_vm1, %v7017_v0 }
  0x69   :  { %6413 = vmatprep.subr.bf16.mxu0 %v7017_v0  ;;  %6419 = vmatprep.subr.bf16.mxu1 %v7017_v0 }
  0x6e   :  { %6404 = vmatmul.mubr.msk.bf16.vlgmr.msra.gmra.mxu0 %vm82_vm2, %v41_v29  ;;  %6410 = vmatmul.mubr.msk.bf16.vlgmr.msra.gmra.mxu1 %vm82_vm2, %v42_v30 }
  0x6f   :  { %6414 = vmatpush3.bf16.msra.mxu0 %v7045_v2  ;;  %6420 = vmatpush3.bf16.msra.mxu1 %v7045_v2 }
  0x70   :  { %6415 = vmatprep.mubr.msk.bf16.mxu0 %vm7018_vm1, %v7017_v0  ;;  %6421 = vmatprep.mubr.msk.bf16.mxu1 %vm7018_vm1, %v7017_v0 }
  0x71   :  { %6425 = vmatprep.subr.bf16.mxu0 %v7017_v0  ;;  %6431 = vmatprep.subr.bf16.mxu1 %v7017_v0 }
  0x76   :  { %6416 = vmatmul.mubr.msk.bf16.vlgmr.msra.gmra.mxu0 %vm82_vm2, %v43_v31  ;;  %6422 = vmatmul.mubr.msk.bf16.vlgmr.msra.gmra.mxu1 %vm82_vm2, %v44_v32 }
  0x77   :  { %6426 = vmatpush3.bf16.msra.mxu0 %v7045_v2  ;;  %6432 = vmatpush3.bf16.msra.mxu1 %v7045_v2 }
  0x78   :  { %6427 = vmatprep.mubr.msk.bf16.mxu0 %vm7018_vm1, %v7017_v0  ;;  %6433 = vmatprep.mubr.msk.bf16.mxu1 %vm7018_vm1, %v7017_v0 }
  0x79   :  { %6437 = vmatprep.subr.bf16.mxu0 %v7017_v0  ;;  %6443 = vmatprep.subr.bf16.mxu1 %v7017_v0 }
  0x7e   :  { %6428 = vmatmul.mubr.msk.bf16.vlgmr.msra.gmra.mxu0 %vm82_vm2, %v45_v33  ;;  %6434 = vmatmul.mubr.msk.bf16.vlgmr.msra.gmra.mxu1 %vm82_vm2, %v46_v34 }
  0x7f   :  { %6438 = vmatpush3.bf16.msra.mxu0 %v7045_v2  ;;  %6444 = vmatpush3.bf16.msra.mxu1 %v7045_v2 }
  0x80   :  { %6439 = vmatprep.mubr.msk.bf16.mxu0 %vm7018_vm1, %v7017_v0  ;;  %6445 = vmatprep.mubr.msk.bf16.mxu1 %vm7018_vm1, %v7017_v0 }
  0x81   :  { %6449 = vmatprep.subr.bf16.mxu0 %v7017_v0  ;;  %6455 = vmatprep.subr.bf16.mxu1 %v7017_v0 }
  0x86   :  { %6440 = vmatmul.mubr.msk.bf16.vlgmr.msra.gmra.mxu0 %vm82_vm2, %v47_v35  ;;  %6446 = vmatmul.mubr.msk.bf16.vlgmr.msra.gmra.mxu1 %vm82_vm2, %v48_v36 }
  0x87   :  { %6450 = vmatpush3.bf16.msra.mxu0 %v7045_v2  ;;  %6456 = vmatpush3.bf16.msra.mxu1 %v7045_v2 }
  0x88   :  { %6451 = vmatprep.mubr.msk.bf16.mxu0 %vm7018_vm1, %v7017_v0  ;;  %6457 = vmatprep.mubr.msk.bf16.mxu1 %vm7018_vm1, %v7017_v0 }
  0x89   :  { %6461 = vmatprep.subr.bf16.mxu0 %v7017_v0  ;;  %6467 = vmatprep.subr.bf16.mxu1 %v7017_v0 }
  0x8e   :  { %6452 = vmatmul.mubr.msk.bf16.vlgmr.msra.gmra.mxu0 %vm82_vm2, %v49_v37  ;;  %6458 = vmatmul.mubr.msk.bf16.vlgmr.msra.gmra.mxu1 %vm82_vm2, %v50_v38  ;;  %v73_v37 = vld [vmem:[%s8720_s0 + $0xe8] sm:$0xf]  ;;  %v74_v38 = vld [vmem:[%s8720_s0 + $0xec] sm:$0xf] }
  0x8f   :  { %6462 = vmatpush3.bf16.msra.mxu0 %v7045_v2  ;;  %6468 = vmatpush3.bf16.msra.mxu1 %v7045_v2 }
  0x90   :  { %6463 = vmatprep.mubr.msk.bf16.mxu0 %vm7018_vm1, %v7017_v0  ;;  %6469 = vmatprep.mubr.msk.bf16.mxu1 %vm7018_vm1, %v7017_v0 }
  0x91   :  { %6473 = vmatprep.subr.bf16.mxu0 %v7017_v0  ;;  %6479 = vmatprep.subr.bf16.mxu1 %v7017_v0 }
  0x96   :  { %6464 = vmatmul.mubr.msk.bf16.vlgmr.msra.gmra.mxu0 %vm82_vm2, %v51_v39  ;;  %6470 = vmatmul.mubr.msk.bf16.vlgmr.msra.gmra.mxu1 %vm82_vm2, %v52_v40 }
  0x97   :  { %6474 = vmatpush3.bf16.msra.mxu0 %v7045_v2  ;;  %6480 = vmatpush3.bf16.msra.mxu1 %v7045_v2 }
  0x98   :  { %6475 = vmatprep.mubr.msk.bf16.mxu0 %vm7018_vm1, %v7017_v0  ;;  %6481 = vmatprep.mubr.msk.bf16.mxu1 %vm7018_vm1, %v7017_v0 }
  0x99   :  { %6485 = vmatprep.subr.bf16.mxu0 %v7017_v0  ;;  %6491 = vmatprep.subr.bf16.mxu1 %v7017_v0 }
  0x9e   :  { %6476 = vmatmul.mubr.msk.bf16.vlgmr.msra.gmra.mxu0 %vm82_vm2, %v53_v41  ;;  %6482 = vmatmul.mubr.msk.bf16.vlgmr.msra.gmra.mxu1 %vm82_vm2, %v54_v42 }
  0x9f   :  { %6486 = vmatpush3.bf16.msra.mxu0 %v7045_v2  ;;  %6492 = vmatpush3.bf16.msra.mxu1 %v7045_v2 }
  0xa0   :  { %6487 = vmatprep.mubr.msk.bf16.mxu0 %vm7018_vm1, %v7017_v0  ;;  %6493 = vmatprep.mubr.msk.bf16.mxu1 %vm7018_vm1, %v7017_v0 }
  0xa1   :  { %6497 = vmatprep.subr.bf16.mxu0 %v7017_v0  ;;  %6503 = vmatprep.subr.bf16.mxu1 %v7017_v0 }
  0xa6   :  { %6488 = vmatmul.mubr.msk.bf16.vlgmr.msra.gmra.mxu0 %vm82_vm2, %v55_v43  ;;  %6494 = vmatmul.mubr.msk.bf16.vlgmr.msra.gmra.mxu1 %vm82_vm2, %v56_v44 }
  0xa7   :  { %6498 = vmatpush3.bf16.msra.mxu0 %v7045_v2  ;;  %6504 = vmatpush3.bf16.msra.mxu1 %v7045_v2 }
  0xa8   :  { %6499 = vmatprep.mubr.msk.bf16.mxu0 %vm7018_vm1, %v7017_v0  ;;  %6505 = vmatprep.mubr.msk.bf16.mxu1 %vm7018_vm1, %v7017_v0 }
  0xa9   :  { %6509 = vmatprep.subr.bf16.mxu0 %v7017_v0  ;;  %6515 = vmatprep.subr.bf16.mxu1 %v7017_v0 }
  0xae   :  { %6500 = vmatmul.mubr.msk.bf16.vlgmr.msra.gmra.mxu0 %vm82_vm2, %v57_v45  ;;  %6506 = vmatmul.mubr.msk.bf16.vlgmr.msra.gmra.mxu1 %vm82_vm2, %v58_v46 }
  0xaf   :  { %6510 = vmatpush3.bf16.msra.mxu0 %v7045_v2  ;;  %6516 = vmatpush3.bf16.msra.mxu1 %v7045_v2 }
  0xb0   :  { %6511 = vmatprep.mubr.msk.bf16.mxu0 %vm7018_vm1, %v7017_v0  ;;  %6517 = vmatprep.mubr.msk.bf16.mxu1 %vm7018_vm1, %v7017_v0 }
  0xb1   :  { %6521 = vmatprep.subr.bf16.mxu0 %v7017_v0  ;;  %6527 = vmatprep.subr.bf16.mxu1 %v7017_v0 }
  0xb6   :  { %6512 = vmatmul.mubr.msk.bf16.vlgmr.msra.gmra.mxu0 %vm82_vm2, %v59_v47  ;;  %6518 = vmatmul.mubr.msk.bf16.vlgmr.msra.gmra.mxu1 %vm82_vm2, %v60_v48  ;;  %v75_v47 = vld [vmem:[%s8720_s0 + $0xf0] sm:$0xf]  ;;  %v76_v48 = vld [vmem:[%s8720_s0 + $0xf4] sm:$0xf] }
  0xb7   :  { %6522 = vmatpush3.bf16.msra.mxu0 %v7045_v2  ;;  %6528 = vmatpush3.bf16.msra.mxu1 %v7045_v2 }
  0xb8   :  { %6523 = vmatprep.mubr.msk.bf16.mxu0 %vm7018_vm1, %v7017_v0  ;;  %6529 = vmatprep.mubr.msk.bf16.mxu1 %vm7018_vm1, %v7017_v0 }
  0xb9   :  { %6533 = vmatprep.subr.bf16.mxu0 %v7017_v0  ;;  %6539 = vmatprep.subr.bf16.mxu1 %v7017_v0 }
  0xbe   :  { %6524 = vmatmul.mubr.msk.bf16.vlgmr.msra.gmra.mxu0 %vm82_vm2, %v61_v49  ;;  %6530 = vmatmul.mubr.msk.bf16.vlgmr.msra.gmra.mxu1 %vm82_vm2, %v62_v50 }
  0xbf   :  { %6534 = vmatpush3.bf16.msra.mxu0 %v7045_v2  ;;  %6540 = vmatpush3.bf16.msra.mxu1 %v7045_v2 }
  0xc0   :  { %6535 = vmatprep.mubr.msk.bf16.mxu0 %vm7018_vm1, %v7017_v0  ;;  %6541 = vmatprep.mubr.msk.bf16.mxu1 %vm7018_vm1, %v7017_v0 }
  0xc1   :  { %6545 = vmatprep.subr.bf16.mxu0 %v7017_v0  ;;  %6551 = vmatprep.subr.bf16.mxu1 %v7017_v0 }
  0xc6   :  { %v7445_v53 = vpop.f32.mrf.mxu0  ;;  %v7447_v54 = vpop.f32.mrf.mxu1  ;;  %6536 = vmatmul.mubr.msk.bf16.vlgmr.msra.gmra.mxu0 %vm82_vm2, %v63_v51  ;;  %6542 = vmatmul.mubr.msk.bf16.vlgmr.msra.gmra.mxu1 %vm82_vm2, %v64_v52 }
  0xc7   :  { %6546 = vmatpush3.bf16.msra.mxu0 %v7045_v2  ;;  %6552 = vmatpush3.bf16.msra.mxu1 %v7045_v2 }
  0xc8   :  { %v6249_v55 = vpop.f32.mrf.mxu0  ;;  %v6255_v56 = vpop.f32.mrf.mxu1  ;;  %6547 = vmatprep.mubr.msk.bf16.mxu0 %vm7018_vm1, %v7017_v0  ;;  %6553 = vmatprep.mubr.msk.bf16.mxu1 %vm7018_vm1, %v7017_v0 }
  0xc9   :  { %6557 = vmatprep.subr.bf16.mxu0 %v7017_v0  ;;  %6563 = vmatprep.subr.bf16.mxu1 %v7017_v0 }
  0xca   :  { %v127_v57 = vpop.f32.mrf.mxu0  ;;  %v170_v58 = vpop.f32.mrf.mxu1 }
  0xcb   :  { %v2839_v57 = vpack.c.bf16 %v7445_v53, %v7445_v53  ;;  %v2840_v58 = vpack.c.bf16 %v7447_v54, %v7447_v54 }
  0xcc   :  { %v6250_v61 = vpop.f32.mrf.mxu0  ;;  %v6256_v62 = vpop.f32.mrf.mxu1 }
  0xcd   :  { %v78_v61 = vld [vmem:[%s8720_s0 + $0xfc] sm:$0xf] }
  0xce   :  { %v7465_v63 = vpop.f32.mrf.mxu0  ;;  %v7467_v1 = vpop.f32.mrf.mxu1  ;;  %6548 = vmatmul.mubr.msk.bf16.vlgmr.msra.gmra.mxu0 %vm82_vm2, %v65_v59  ;;  %6554 = vmatmul.mubr.msk.bf16.vlgmr.msra.gmra.mxu1 %vm82_vm2, %v66_v60  ;;  %v77_v60 = vld [vmem:[%s8720_s0 + $0xf8] sm:$0xf] }
  0xcf   :  { %6558 = vmatpush3.bf16.msra.mxu0 %v7045_v2  ;;  %6564 = vmatpush3.bf16.msra.mxu1 %v7045_v2 }
  0xd0   :  { %v6261_v3 = vpop.f32.mrf.mxu0  ;;  %v6267_v4 = vpop.f32.mrf.mxu1  ;;  %6559 = vmatprep.mubr.msk.bf16.mxu0 %vm7018_vm1, %v7017_v0  ;;  %6565 = vmatprep.mubr.msk.bf16.mxu1 %vm7018_vm1, %v7017_v0 }
  0xd1   :  { %6569 = vmatprep.subr.bf16.mxu0 %v7017_v0  ;;  %6575 = vmatprep.subr.bf16.mxu1 %v7017_v0  ;;  %v2912_v4 = vsel %vm86_vm0, %v2839_v57, 0 }
  0xd2   :  { %v213_v5 = vpop.f32.mrf.mxu0  ;;  %v256_v6 = vpop.f32.mrf.mxu1 }
  0xd3   :  { %v2956_v5 = vsel %vm86_vm0, %v2840_v58, 0 }
  0xd4   :  { %v6262_v9 = vpop.f32.mrf.mxu0  ;;  %v6268_v10 = vpop.f32.mrf.mxu1 }
  0xd5   :  { %v2842_v9 = vpack.c.bf16 %v7467_v1, %v7467_v1 }
  0xd6   :  { %v7485_v11 = vpop.f32.mrf.mxu0  ;;  %v7487_v12 = vpop.f32.mrf.mxu1  ;;  %6560 = vmatmul.mubr.msk.bf16.vlgmr.msra.gmra.mxu0 %vm82_vm2, %v67_v7  ;;  %6566 = vmatmul.mubr.msk.bf16.vlgmr.msra.gmra.mxu1 %vm82_vm2, %v68_v8  ;;  %v2841_v8 = vpack.c.bf16 %v7465_v63, %v7465_v63 }
  0xd7   :  { %6570 = vmatpush3.bf16.msra.mxu0 %v7045_v2  ;;  %6576 = vmatpush3.bf16.msra.mxu1 %v7045_v2 }
  0xd8   :  { %v6273_v13 = vpop.f32.mrf.mxu0  ;;  %v6279_v14 = vpop.f32.mrf.mxu1  ;;  %6571 = vmatprep.mubr.msk.bf16.mxu0 %vm7018_vm1, %v7017_v0  ;;  %6577 = vmatprep.mubr.msk.bf16.mxu1 %vm7018_vm1, %v7017_v0 }
  0xd9   :  { %6581 = vmatprep.subr.bf16.mxu0 %v7017_v0  ;;  %6587 = vmatprep.subr.bf16.mxu1 %v7017_v0  ;;  %v7610_v14 = vld [vmem:[%s8721_s2] sm:$0xff]  }
  0xda   :  { %v299_v15 = vpop.f32.mrf.mxu0  ;;  %v342_v16 = vpop.f32.mrf.mxu1 }
  0xdc   :  { %v6274_v19 = vpop.f32.mrf.mxu0  ;;  %v6280_v20 = vpop.f32.mrf.mxu1 }
  0xde   :  { %v7505_v21 = vpop.f32.mrf.mxu0  ;;  %v7507_v22 = vpop.f32.mrf.mxu1  ;;  %6572 = vmatmul.mubr.msk.bf16.vlgmr.msra.gmra.mxu0 %vm82_vm2, %v69_v17  ;;  %6578 = vmatmul.mubr.msk.bf16.vlgmr.msra.gmra.mxu1 %vm82_vm2, %v70_v18  ;;  %v3000_v17 = vsel %vm86_vm0, %v2841_v8, 0  ;;  %v3044_v18 = vsel %vm86_vm0, %v2842_v9, 0 }
  0xdf   :  { %6582 = vmatpush3.bf16.msra.mxu0 %v7045_v2  ;;  %6588 = vmatpush3.bf16.msra.mxu1 %v7045_v2 }
  0xe0   :  { %v6285_v23 = vpop.f32.mrf.mxu0  ;;  %v6291_v24 = vpop.f32.mrf.mxu1  ;;  %6583 = vmatprep.mubr.msk.bf16.mxu0 %vm7018_vm1, %v7017_v0  ;;  %6589 = vmatprep.mubr.msk.bf16.mxu1 %vm7018_vm1, %v7017_v0 }
  0xe1   :  { %6593 = vmatprep.subr.bf16.mxu0 %v7017_v0  ;;  %6599 = vmatprep.subr.bf16.mxu1 %v7017_v0  ;;  %v2843_v23 = vpack.c.bf16 %v7485_v11, %v7485_v11  ;;  %v2844_v24 = vpack.c.bf16 %v7487_v12, %v7487_v12 }
  0xe2   :  { %v385_v25 = vpop.f32.mrf.mxu0  ;;  %v428_v26 = vpop.f32.mrf.mxu1 }
  0xe4   :  { %v6286_v29 = vpop.f32.mrf.mxu0  ;;  %v6292_v30 = vpop.f32.mrf.mxu1 }
  0xe5   :  { %v3088_v29 = vsel %vm86_vm0, %v2843_v23, 0  ;;  %v3132_v30 = vsel %vm86_vm0, %v2844_v24, 0 }
  0xe6   :  { %v7525_v31 = vpop.f32.mrf.mxu0  ;;  %v7527_v32 = vpop.f32.mrf.mxu1  ;;  %6584 = vmatmul.mubr.msk.bf16.vlgmr.msra.gmra.mxu0 %vm82_vm2, %v71_v27  ;;  %6590 = vmatmul.mubr.msk.bf16.vlgmr.msra.gmra.mxu1 %vm82_vm2, %v72_v28 }
  0xe7   :  { %6594 = vmatpush3.bf16.msra.mxu0 %v7045_v2  ;;  %6600 = vmatpush3.bf16.msra.mxu1 %v7045_v2 }
  0xe8   :  { %v6297_v33 = vpop.f32.mrf.mxu0  ;;  %v6303_v34 = vpop.f32.mrf.mxu1  ;;  %6595 = vmatprep.mubr.msk.bf16.mxu0 %vm7018_vm1, %v7017_v0  ;;  %6601 = vmatprep.mubr.msk.bf16.mxu1 %vm7018_vm1, %v7017_v0 }
  0xe9   :  { %6605 = vmatprep.subr.bf16.mxu0 %v7017_v0  ;;  %6611 = vmatprep.subr.bf16.mxu1 %v7017_v0 }
  0xea   :  { %v471_v35 = vpop.f32.mrf.mxu0  ;;  %v514_v36 = vpop.f32.mrf.mxu1 }
  0xeb   :  { %v2845_v35 = vpack.c.bf16 %v7505_v21, %v7505_v21  ;;  %v2846_v36 = vpack.c.bf16 %v7507_v22, %v7507_v22 }
  0xec   :  { %v6298_v39 = vpop.f32.mrf.mxu0  ;;  %v6304_v40 = vpop.f32.mrf.mxu1 }
  0xee   :  { %v7545_v41 = vpop.f32.mrf.mxu0  ;;  %v7547_v42 = vpop.f32.mrf.mxu1  ;;  %6596 = vmatmul.mubr.msk.bf16.vlgmr.msra.gmra.mxu0 %vm82_vm2, %v73_v37  ;;  %6602 = vmatmul.mubr.msk.bf16.vlgmr.msra.gmra.mxu1 %vm82_vm2, %v74_v38 }
  0xef   :  { %6606 = vmatpush3.bf16.msra.mxu0 %v7045_v2  ;;  %6612 = vmatpush3.bf16.msra.mxu1 %v7045_v2 }
  0xf0   :  { %v6309_v43 = vpop.f32.mrf.mxu0  ;;  %v6315_v44 = vpop.f32.mrf.mxu1  ;;  %6607 = vmatprep.mubr.msk.bf16.mxu0 %vm7018_vm1, %v7017_v0  ;;  %6613 = vmatprep.mubr.msk.bf16.mxu1 %vm7018_vm1, %v7017_v0 }
  0xf1   :  { %6617 = vmatprep.subr.bf16.mxu0 %v7017_v0  ;;  %6623 = vmatprep.subr.bf16.mxu1 %v7017_v0  ;;  %v3176_v43 = vsel %vm86_vm0, %v2845_v35, 0  ;;  %v3220_v44 = vsel %vm86_vm0, %v2846_v36, 0 }
  0xf2   :  { %v557_v45 = vpop.f32.mrf.mxu0  ;;  %v600_v46 = vpop.f32.mrf.mxu1 }
  0xf4   :  { %v6310_v49 = vpop.f32.mrf.mxu0  ;;  %v6316_v50 = vpop.f32.mrf.mxu1 }
  0xf6   :  { %v7565_v51 = vpop.f32.mrf.mxu0  ;;  %v7567_v52 = vpop.f32.mrf.mxu1  ;;  %6608 = vmatmul.mubr.msk.bf16.vlgmr.msra.gmra.mxu0 %vm82_vm2, %v75_v47  ;;  %6614 = vmatmul.mubr.msk.bf16.vlgmr.msra.gmra.mxu1 %vm82_vm2, %v76_v48  ;;  %v2847_v47 = vpack.c.bf16 %v7525_v31, %v7525_v31  ;;  %v2848_v48 = vpack.c.bf16 %v7527_v32, %v7527_v32 }
  0xf7   :  { %6618 = vmatpush3.bf16.msra.mxu0 %v7045_v2  ;;  %6624 = vmatpush3.bf16.msra.mxu1 %v7045_v2 }
  0xf8   :  { %v6321_v55 = vpop.f32.mrf.mxu0  ;;  %v6327_v56 = vpop.f32.mrf.mxu1  ;;  %6619 = vmatprep.mubr.msk.bf16.mxu0 %vm7018_vm1, %v7017_v0  ;;  %6625 = vmatprep.mubr.msk.bf16.mxu1 %vm7018_vm1, %v7017_v0  ;;  %v3264_v57 = vsel %vm86_vm0, %v2847_v47, 0  ;;  %v3308_v58 = vsel %vm86_vm0, %v2848_v48, 0 }
  0xf9   :  { %6629 = vmatprep.subr.bf16.mxu0 %v7017_v0  ;;  %6635 = vmatprep.subr.bf16.mxu1 %v7017_v0 }
  0xfa   :  { %v643_v59 = vpop.f32.mrf.mxu0  ;;  %v686_v2 = vpop.f32.mrf.mxu1 }
  0xfc   :  { %v6322_v62 = vpop.f32.mrf.mxu0  ;;  %v6328_v3 = vpop.f32.mrf.mxu1 }
  0xfe   :  { %v7591_v53 = vpop.f32.mrf.mxu0  ;;  %v7593_v6 = vpop.f32.mrf.mxu1  ;;  %6620 = vmatmul.mubr.msk.bf16.vlgmr.msra.gmra.mxu0 %vm82_vm2, %v77_v60  ;;  %6626 = vmatmul.mubr.msk.bf16.vlgmr.msra.gmra.mxu1 %vm82_vm2, %v78_v61  ;;  %v2849_v60 = vpack.c.bf16 %v7545_v41, %v7545_v41  ;;  %v2850_v61 = vpack.c.bf16 %v7547_v42, %v7547_v42 }
  0xff   :  { %6630 = vmatpush3.bf16.msra.mxu0 %v2912_v4  ;;  %6636 = vmatpush3.bf16.msra.mxu1 %v2956_v5 }
 0x100   :  { %v6333_v54 = vpop.f32.mrf.mxu0  ;;  %v6339_v7 = vpop.f32.mrf.mxu1  ;;  %6631 = vmatprep.mubr.msk.bf16.mxu0 %vm7018_vm1, %v7017_v0  ;;  %6637 = vmatprep.mubr.msk.bf16.mxu1 %vm7018_vm1, %v7017_v0 }
 0x101   :  { %6641 = vmatprep.subr.bf16.mxu0 %v7017_v0  ;;  %6647 = vmatprep.subr.bf16.mxu1 %v7017_v0  ;;  %v3352_v54 = vsel %vm86_vm0, %v2849_v60, 0  ;;  %v3396_v7 = vsel %vm86_vm0, %v2850_v61, 0 }
 0x102   :  { %v729_v10 = vpop.f32.mrf.mxu0  ;;  %v772_v13 = vpop.f32.mrf.mxu1 }
 0x103   :  { %v2851_v10 = vpack.c.bf16 %v7565_v51, %v7565_v51  ;;  %v2852_v13 = vpack.c.bf16 %v7567_v52, %v7567_v52 }
 0x104   :  { %v6334_v15 = vpop.f32.mrf.mxu0  ;;  %v6340_v16 = vpop.f32.mrf.mxu1 }
 0x106   :  { %v7614_v19 = vpop.f32.mrf.mxu0  ;;  %v7616_v20 = vpop.f32.mrf.mxu1  ;;  %6632 = vmatmul.mubr.msk.bf16.vlgmr.msra.gmra.mxu0 %vm82_vm2, %v7610_v14  ;;  %6638 = vmatmul.mubr.msk.bf16.vlgmr.msra.gmra.mxu1 %vm82_vm2, %v7610_v14 }
 0x107   :  { %6642 = vmatpush3.bf16.msra.mxu0 %v3000_v17  ;;  %6648 = vmatpush3.bf16.msra.mxu1 %v3044_v18 }
 0x108   :  { %v6345_v63 = vpop.f32.mrf.mxu0  ;;  %v6351_v1 = vpop.f32.mrf.mxu1  ;;  %6643 = vmatprep.mubr.msk.bf16.mxu0 %vm7018_vm1, %v7017_v0  ;;  %6649 = vmatprep.mubr.msk.bf16.mxu1 %vm7018_vm1, %v7017_v0 }
 0x109   :  { %6653 = vmatprep.subr.bf16.mxu0 %v7017_v0  ;;  %6659 = vmatprep.subr.bf16.mxu1 %v7017_v0  ;;  %v3440_v63 = vsel %vm86_vm0, %v2851_v10, 0  ;;  %v3484_v1 = vsel %vm86_vm0, %v2852_v13, 0 }
 0x10a   :  { %v815_v25 = vpop.f32.mrf.mxu0  ;;  %v858_v26 = vpop.f32.mrf.mxu1 }
 0x10b   :  { %v2853_v25 = vpack.c.bf16 %v7591_v53, %v7591_v53  ;;  %v2854_v26 = vpack.c.bf16 %v7593_v6, %v7593_v6 }
 0x10c   :  { %v6346_v27 = vpop.f32.mrf.mxu0  ;;  %v6352_v28 = vpop.f32.mrf.mxu1 }
 0x10e   :  { %v7634_v33 = vpop.f32.mrf.mxu0  ;;  %v7636_v34 = vpop.f32.mrf.mxu1  ;;  %6644 = vmatmul.mubr.msk.bf16.vlgmr.msra.gmra.mxu0 %vm82_vm2, %v7610_v14  ;;  %6650 = vmatmul.mubr.msk.bf16.vlgmr.msra.gmra.mxu1 %vm82_vm2, %v7610_v14 }
 0x10f   :  { %6654 = vmatpush3.bf16.msra.mxu0 %v3088_v29  ;;  %6660 = vmatpush3.bf16.msra.mxu1 %v3132_v30 }
 0x110   :  { %v6357_v11 = vpop.f32.mrf.mxu0  ;;  %v6363_v12 = vpop.f32.mrf.mxu1  ;;  %6655 = vmatprep.mubr.msk.bf16.mxu0 %vm7018_vm1, %v7017_v0  ;;  %6661 = vmatprep.mubr.msk.bf16.mxu1 %vm7018_vm1, %v7017_v0 }
 0x111   :  { %6665 = vmatprep.subr.bf16.mxu0 %v7017_v0  ;;  %6671 = vmatprep.subr.bf16.mxu1 %v7017_v0  ;;  %v3528_v11 = vsel %vm86_vm0, %v2853_v25, 0  ;;  %v3572_v12 = vsel %vm86_vm0, %v2854_v26, 0 }
 0x112   :  { %v901_v37 = vpop.f32.mrf.mxu0  ;;  %v944_v38 = vpop.f32.mrf.mxu1 }
 0x113   :  { %v2855_v37 = vpack.c.bf16 %v7614_v19, %v7614_v19  ;;  %v2856_v38 = vpack.c.bf16 %v7616_v20, %v7616_v20 }
 0x114   :  { %v6358_v39 = vpop.f32.mrf.mxu0  ;;  %v6364_v40 = vpop.f32.mrf.mxu1 }
 0x116   :  { %v7654_v45 = vpop.f32.mrf.mxu0  ;;  %v7656_v46 = vpop.f32.mrf.mxu1  ;;  %6656 = vmatmul.mubr.msk.bf16.vlgmr.msra.gmra.mxu0 %vm82_vm2, %v7610_v14  ;;  %6662 = vmatmul.mubr.msk.bf16.vlgmr.msra.gmra.mxu1 %vm82_vm2, %v7610_v14 }
 0x117   :  { %6666 = vmatpush3.bf16.msra.mxu0 %v3176_v43  ;;  %6672 = vmatpush3.bf16.msra.mxu1 %v3220_v44 }
 0x118   :  { %v6369_v21 = vpop.f32.mrf.mxu0  ;;  %v6375_v22 = vpop.f32.mrf.mxu1  ;;  %6667 = vmatprep.mubr.msk.bf16.mxu0 %vm7018_vm1, %v7017_v0  ;;  %6673 = vmatprep.mubr.msk.bf16.mxu1 %vm7018_vm1, %v7017_v0 }
 0x119   :  { %6677 = vmatprep.subr.bf16.mxu0 %v7017_v0  ;;  %6683 = vmatprep.subr.bf16.mxu1 %v7017_v0  ;;  %v3616_v21 = vsel %vm86_vm0, %v2855_v37, 0  ;;  %v3660_v22 = vsel %vm86_vm0, %v2856_v38, 0 }
 0x11a   :  { %v987_v49 = vpop.f32.mrf.mxu0  ;;  %v1030_v50 = vpop.f32.mrf.mxu1 }
 0x11b   :  { %v2857_v49 = vpack.c.bf16 %v7634_v33, %v7634_v33  ;;  %v2858_v50 = vpack.c.bf16 %v7636_v34, %v7636_v34 }
 0x11c   :  { %v6370_v55 = vpop.f32.mrf.mxu0  ;;  %v6376_v56 = vpop.f32.mrf.mxu1 }
 0x11e   :  { %v7674_v59 = vpop.f32.mrf.mxu0  ;;  %v7676_v2 = vpop.f32.mrf.mxu1  ;;  %6668 = vmatmul.mubr.msk.bf16.vlgmr.msra.gmra.mxu0 %vm82_vm2, %v7610_v14  ;;  %6674 = vmatmul.mubr.msk.bf16.vlgmr.msra.gmra.mxu1 %vm82_vm2, %v7610_v14 }
 0x11f   :  { %6678 = vmatpush3.bf16.msra.mxu0 %v3264_v57  ;;  %6684 = vmatpush3.bf16.msra.mxu1 %v3308_v58 }
 0x120   :  { %v6381_v31 = vpop.f32.mrf.mxu0  ;;  %v6387_v32 = vpop.f32.mrf.mxu1  ;;  %6679 = vmatprep.mubr.msk.bf16.mxu0 %vm7018_vm1, %v7017_v0  ;;  %6685 = vmatprep.mubr.msk.bf16.mxu1 %vm7018_vm1, %v7017_v0 }
 0x121   :  { %6689 = vmatprep.subr.bf16.mxu0 %v7017_v0  ;;  %6695 = vmatprep.subr.bf16.mxu1 %v7017_v0  ;;  %v3704_v31 = vsel %vm86_vm0, %v2857_v49, 0  ;;  %v3748_v32 = vsel %vm86_vm0, %v2858_v50, 0 }
 0x122   :  { %v1073_v62 = vpop.f32.mrf.mxu0  ;;  %v1116_v3 = vpop.f32.mrf.mxu1 }
 0x123   :  { %v2859_v62 = vpack.c.bf16 %v7654_v45, %v7654_v45  ;;  %v2860_v3 = vpack.c.bf16 %v7656_v46, %v7656_v46 }
 0x124   :  { %v6382_v4 = vpop.f32.mrf.mxu0  ;;  %v6388_v5 = vpop.f32.mrf.mxu1 }
 0x126   :  { %v7694_v8 = vpop.f32.mrf.mxu0  ;;  %v7696_v9 = vpop.f32.mrf.mxu1  ;;  %6680 = vmatmul.mubr.msk.bf16.vlgmr.msra.gmra.mxu0 %vm82_vm2, %v7610_v14  ;;  %6686 = vmatmul.mubr.msk.bf16.vlgmr.msra.gmra.mxu1 %vm82_vm2, %v7610_v14 }
 0x127   :  { %6690 = vmatpush3.bf16.msra.mxu0 %v3352_v54  ;;  %6696 = vmatpush3.bf16.msra.mxu1 %v3396_v7 }
 0x128   :  { %v6393_v41 = vpop.f32.mrf.mxu0  ;;  %v6399_v42 = vpop.f32.mrf.mxu1  ;;  %6691 = vmatprep.mubr.msk.bf16.mxu0 %vm7018_vm1, %v7017_v0  ;;  %6697 = vmatprep.mubr.msk.bf16.mxu1 %vm7018_vm1, %v7017_v0 }
 0x129   :  { %6701 = vmatprep.subr.bf16.mxu0 %v7017_v0  ;;  %6707 = vmatprep.subr.bf16.mxu1 %v7017_v0  ;;  %v3792_v41 = vsel %vm86_vm0, %v2859_v62, 0  ;;  %v3836_v42 = vsel %vm86_vm0, %v2860_v3, 0 }
 0x12a   :  { %v1159_v15 = vpop.f32.mrf.mxu0  ;;  %v1202_v16 = vpop.f32.mrf.mxu1 }
 0x12b   :  { %v2861_v15 = vpack.c.bf16 %v7674_v59, %v7674_v59  ;;  %v2862_v16 = vpack.c.bf16 %v7676_v2, %v7676_v2 }
 0x12c   :  { %v6394_v17 = vpop.f32.mrf.mxu0  ;;  %v6400_v18 = vpop.f32.mrf.mxu1 }
 0x12e   :  { %v7714_v23 = vpop.f32.mrf.mxu0  ;;  %v7716_v24 = vpop.f32.mrf.mxu1  ;;  %6692 = vmatmul.mubr.msk.bf16.vlgmr.msra.gmra.mxu0 %vm82_vm2, %v7610_v14  ;;  %6698 = vmatmul.mubr.msk.bf16.vlgmr.msra.gmra.mxu1 %vm82_vm2, %v7610_v14 }
 0x12f   :  { %6702 = vmatpush3.bf16.msra.mxu0 %v3440_v63  ;;  %6708 = vmatpush3.bf16.msra.mxu1 %v3484_v1 }
 0x130   :  { %v6405_v51 = vpop.f32.mrf.mxu0  ;;  %v6411_v52 = vpop.f32.mrf.mxu1  ;;  %6703 = vmatprep.mubr.msk.bf16.mxu0 %vm7018_vm1, %v7017_v0  ;;  %6709 = vmatprep.mubr.msk.bf16.mxu1 %vm7018_vm1, %v7017_v0 }
 0x131   :  { %6713 = vmatprep.subr.bf16.mxu0 %v7017_v0  ;;  %6719 = vmatprep.subr.bf16.mxu1 %v7017_v0  ;;  %v3880_v51 = vsel %vm86_vm0, %v2861_v15, 0  ;;  %v3924_v52 = vsel %vm86_vm0, %v2862_v16, 0 }
 0x132   :  { %v1245_v27 = vpop.f32.mrf.mxu0  ;;  %v1288_v28 = vpop.f32.mrf.mxu1 }
 0x133   :  { %v2863_v27 = vpack.c.bf16 %v7694_v8, %v7694_v8  ;;  %v2864_v28 = vpack.c.bf16 %v7696_v9, %v7696_v9 }
 0x134   :  { %v6406_v29 = vpop.f32.mrf.mxu0  ;;  %v6412_v30 = vpop.f32.mrf.mxu1 }
 0x136   :  { %v7734_v35 = vpop.f32.mrf.mxu0  ;;  %v7736_v36 = vpop.f32.mrf.mxu1  ;;  %6704 = vmatmul.mubr.msk.bf16.vlgmr.msra.gmra.mxu0 %vm82_vm2, %v7610_v14  ;;  %6710 = vmatmul.mubr.msk.bf16.vlgmr.msra.gmra.mxu1 %vm82_vm2, %v7610_v14 }
 0x137   :  { %6714 = vmatpush3.bf16.msra.mxu0 %v3528_v11  ;;  %6720 = vmatpush3.bf16.msra.mxu1 %v3572_v12 }
 0x138   :  { %v6417_v53 = vpop.f32.mrf.mxu0  ;;  %v6423_v6 = vpop.f32.mrf.mxu1  ;;  %6715 = vmatprep.mubr.msk.bf16.mxu0 %vm7018_vm1, %v7017_v0  ;;  %6721 = vmatprep.mubr.msk.bf16.mxu1 %vm7018_vm1, %v7017_v0 }
 0x139   :  { %6725 = vmatprep.subr.bf16.mxu0 %v7017_v0  ;;  %6731 = vmatprep.subr.bf16.mxu1 %v7017_v0  ;;  %v3968_v53 = vsel %vm86_vm0, %v2863_v27, 0  ;;  %v4012_v6 = vsel %vm86_vm0, %v2864_v28, 0 }
 0x13a   :  { %v1331_v39 = vpop.f32.mrf.mxu0  ;;  %v1374_v40 = vpop.f32.mrf.mxu1 }
 0x13b   :  { %v2865_v39 = vpack.c.bf16 %v7714_v23, %v7714_v23  ;;  %v2866_v40 = vpack.c.bf16 %v7716_v24, %v7716_v24 }
 0x13c   :  { %v6418_v43 = vpop.f32.mrf.mxu0  ;;  %v6424_v44 = vpop.f32.mrf.mxu1 }
 0x13e   :  { %v7754_v47 = vpop.f32.mrf.mxu0  ;;  %v7756_v48 = vpop.f32.mrf.mxu1  ;;  %6716 = vmatmul.mubr.msk.bf16.vlgmr.msra.gmra.mxu0 %vm82_vm2, %v7610_v14  ;;  %6722 = vmatmul.mubr.msk.bf16.vlgmr.msra.gmra.mxu1 %vm82_vm2, %v7610_v14 }
 0x13f   :  { %6726 = vmatpush3.bf16.msra.mxu0 %v3616_v21  ;;  %6732 = vmatpush3.bf16.msra.mxu1 %v3660_v22 }
 0x140   :  { %v6429_v19 = vpop.f32.mrf.mxu0  ;;  %v6435_v20 = vpop.f32.mrf.mxu1  ;;  %6727 = vmatprep.mubr.msk.bf16.mxu0 %vm7018_vm1, %v7017_v0  ;;  %6733 = vmatprep.mubr.msk.bf16.mxu1 %vm7018_vm1, %v7017_v0 }
 0x141   :  { %6737 = vmatprep.subr.bf16.mxu0 %v7017_v0  ;;  %6743 = vmatprep.subr.bf16.mxu1 %v7017_v0  ;;  %v4056_v19 = vsel %vm86_vm0, %v2865_v39, 0  ;;  %v4100_v20 = vsel %vm86_vm0, %v2866_v40, 0 }
 0x142   :  { %v1417_v55 = vpop.f32.mrf.mxu0  ;;  %v1460_v56 = vpop.f32.mrf.mxu1 }
 0x143   :  { %v2867_v55 = vpack.c.bf16 %v7734_v35, %v7734_v35  ;;  %v2868_v56 = vpack.c.bf16 %v7736_v36, %v7736_v36 }
 0x144   :  { %v6430_v57 = vpop.f32.mrf.mxu0  ;;  %v6436_v58 = vpop.f32.mrf.mxu1 }
 0x146   :  { %v7774_v60 = vpop.f32.mrf.mxu0  ;;  %v7776_v61 = vpop.f32.mrf.mxu1  ;;  %6728 = vmatmul.mubr.msk.bf16.vlgmr.msra.gmra.mxu0 %vm82_vm2, %v7610_v14  ;;  %6734 = vmatmul.mubr.msk.bf16.vlgmr.msra.gmra.mxu1 %vm82_vm2, %v7610_v14 }
 0x147   :  { %6738 = vmatpush3.bf16.msra.mxu0 %v3704_v31  ;;  %6744 = vmatpush3.bf16.msra.mxu1 %v3748_v32 }
 0x148   :  { %v6441_v33 = vpop.f32.mrf.mxu0  ;;  %v6447_v34 = vpop.f32.mrf.mxu1  ;;  %6739 = vmatprep.mubr.msk.bf16.mxu0 %vm7018_vm1, %v7017_v0  ;;  %6745 = vmatprep.mubr.msk.bf16.mxu1 %vm7018_vm1, %v7017_v0 }
 0x149   :  { %6749 = vmatprep.subr.bf16.mxu0 %v7017_v0  ;;  %6755 = vmatprep.subr.bf16.mxu1 %v7017_v0  ;;  %v4144_v33 = vsel %vm86_vm0, %v2867_v55, 0  ;;  %v4188_v34 = vsel %vm86_vm0, %v2868_v56, 0 }
 0x14a   :  { %v1503_v4 = vpop.f32.mrf.mxu0  ;;  %v1546_v5 = vpop.f32.mrf.mxu1 }
 0x14b   :  { %v2869_v4 = vpack.c.bf16 %v7754_v47, %v7754_v47  ;;  %v2870_v5 = vpack.c.bf16 %v7756_v48, %v7756_v48 }
 0x14c   :  { %v6442_v54 = vpop.f32.mrf.mxu0  ;;  %v6448_v7 = vpop.f32.mrf.mxu1 }
 0x14e   :  { %v7794_v10 = vpop.f32.mrf.mxu0  ;;  %v7796_v13 = vpop.f32.mrf.mxu1  ;;  %6740 = vmatmul.mubr.msk.bf16.vlgmr.msra.gmra.mxu0 %vm82_vm2, %v7610_v14  ;;  %6746 = vmatmul.mubr.msk.bf16.vlgmr.msra.gmra.mxu1 %vm82_vm2, %v7610_v14 }
 0x14f   :  { %6750 = vmatpush3.bf16.msra.mxu0 %v3792_v41  ;;  %6756 = vmatpush3.bf16.msra.mxu1 %v3836_v42 }
 0x150   :  { %v6453_v45 = vpop.f32.mrf.mxu0  ;;  %v6459_v46 = vpop.f32.mrf.mxu1  ;;  %6751 = vmatprep.mubr.msk.bf16.mxu0 %vm7018_vm1, %v7017_v0  ;;  %6757 = vmatprep.mubr.msk.bf16.mxu1 %vm7018_vm1, %v7017_v0 }
 0x151   :  { %6761 = vmatprep.subr.bf16.mxu0 %v7017_v0  ;;  %6767 = vmatprep.subr.bf16.mxu1 %v7017_v0  ;;  %v4232_v45 = vsel %vm86_vm0, %v2869_v4, 0  ;;  %v4276_v46 = vsel %vm86_vm0, %v2870_v5, 0 }
 0x152   :  { %v1589_v17 = vpop.f32.mrf.mxu0  ;;  %v1632_v18 = vpop.f32.mrf.mxu1 }
 0x153   :  { %v2871_v17 = vpack.c.bf16 %v7774_v60, %v7774_v60  ;;  %v2872_v18 = vpack.c.bf16 %v7776_v61, %v7776_v61 }
 0x154   :  { %v6454_v63 = vpop.f32.mrf.mxu0  ;;  %v6460_v1 = vpop.f32.mrf.mxu1 }
 0x156   :  { %v7814_v25 = vpop.f32.mrf.mxu0  ;;  %v7816_v26 = vpop.f32.mrf.mxu1  ;;  %6752 = vmatmul.mubr.msk.bf16.vlgmr.msra.gmra.mxu0 %vm82_vm2, %v7610_v14  ;;  %6758 = vmatmul.mubr.msk.bf16.vlgmr.msra.gmra.mxu1 %vm82_vm2, %v7610_v14 }
 0x157   :  { %6762 = vmatpush3.bf16.msra.mxu0 %v3880_v51  ;;  %6768 = vmatpush3.bf16.msra.mxu1 %v3924_v52 }
 0x158   :  { %v6465_v59 = vpop.f32.mrf.mxu0  ;;  %v6471_v2 = vpop.f32.mrf.mxu1  ;;  %6763 = vmatprep.mubr.msk.bf16.mxu0 %vm7018_vm1, %v7017_v0  ;;  %6769 = vmatprep.mubr.msk.bf16.mxu1 %vm7018_vm1, %v7017_v0 }
 0x159   :  { %6773 = vmatprep.subr.bf16.mxu0 %v7017_v0  ;;  %6779 = vmatprep.subr.bf16.mxu1 %v7017_v0  ;;  %v4320_v59 = vsel %vm86_vm0, %v2871_v17, 0  ;;  %v4364_v2 = vsel %vm86_vm0, %v2872_v18, 0 }
 0x15a   :  { %v1675_v29 = vpop.f32.mrf.mxu0  ;;  %v1718_v30 = vpop.f32.mrf.mxu1 }
 0x15b   :  { %v2873_v29 = vpack.c.bf16 %v7794_v10, %v7794_v10  ;;  %v2874_v30 = vpack.c.bf16 %v7796_v13, %v7796_v13 }
 0x15c   :  { %v6466_v11 = vpop.f32.mrf.mxu0  ;;  %v6472_v12 = vpop.f32.mrf.mxu1 }
 0x15e   :  { %v7834_v37 = vpop.f32.mrf.mxu0  ;;  %v7836_v38 = vpop.f32.mrf.mxu1  ;;  %6764 = vmatmul.mubr.msk.bf16.vlgmr.msra.gmra.mxu0 %vm82_vm2, %v7610_v14  ;;  %6770 = vmatmul.mubr.msk.bf16.vlgmr.msra.gmra.mxu1 %vm82_vm2, %v7610_v14 }
 0x15f   :  { %6774 = vmatpush3.bf16.msra.mxu0 %v3968_v53  ;;  %6780 = vmatpush3.bf16.msra.mxu1 %v4012_v6 }
 0x160   :  { %v6477_v8 = vpop.f32.mrf.mxu0  ;;  %v6483_v9 = vpop.f32.mrf.mxu1  ;;  %6775 = vmatprep.mubr.msk.bf16.mxu0 %vm7018_vm1, %v7017_v0  ;;  %6781 = vmatprep.mubr.msk.bf16.mxu1 %vm7018_vm1, %v7017_v0 }
 0x161   :  { %6785 = vmatprep.subr.bf16.mxu0 %v7017_v0  ;;  %6791 = vmatprep.subr.bf16.mxu1 %v7017_v0  ;;  %v4408_v8 = vsel %vm86_vm0, %v2873_v29, 0  ;;  %v4452_v9 = vsel %vm86_vm0, %v2874_v30, 0 }
 0x162   :  { %v1761_v43 = vpop.f32.mrf.mxu0  ;;  %v1804_v44 = vpop.f32.mrf.mxu1 }
 0x163   :  { %v2875_v43 = vpack.c.bf16 %v7814_v25, %v7814_v25  ;;  %v2876_v44 = vpack.c.bf16 %v7816_v26, %v7816_v26 }
 0x164   :  { %v6478_v21 = vpop.f32.mrf.mxu0  ;;  %v6484_v22 = vpop.f32.mrf.mxu1 }
 0x166   :  { %v7854_v49 = vpop.f32.mrf.mxu0  ;;  %v7856_v50 = vpop.f32.mrf.mxu1  ;;  %6776 = vmatmul.mubr.msk.bf16.vlgmr.msra.gmra.mxu0 %vm82_vm2, %v7610_v14  ;;  %6782 = vmatmul.mubr.msk.bf16.vlgmr.msra.gmra.mxu1 %vm82_vm2, %v7610_v14 }
 0x167   :  { %6786 = vmatpush3.bf16.msra.mxu0 %v4056_v19  ;;  %6792 = vmatpush3.bf16.msra.mxu1 %v4100_v20 }
 0x168   :  { %v6489_v23 = vpop.f32.mrf.mxu0  ;;  %v6495_v24 = vpop.f32.mrf.mxu1  ;;  %6787 = vmatprep.mubr.msk.bf16.mxu0 %vm7018_vm1, %v7017_v0  ;;  %6793 = vmatprep.mubr.msk.bf16.mxu1 %vm7018_vm1, %v7017_v0 }
 0x169   :  { %6797 = vmatprep.subr.bf16.mxu0 %v7017_v0  ;;  %6803 = vmatprep.subr.bf16.mxu1 %v7017_v0  ;;  %v4496_v23 = vsel %vm86_vm0, %v2875_v43, 0  ;;  %v4540_v24 = vsel %vm86_vm0, %v2876_v44, 0 }
 0x16a   :  { %v1847_v57 = vpop.f32.mrf.mxu0  ;;  %v1890_v58 = vpop.f32.mrf.mxu1 }
 0x16b   :  { %v2877_v57 = vpack.c.bf16 %v7834_v37, %v7834_v37  ;;  %v2878_v58 = vpack.c.bf16 %v7836_v38, %v7836_v38 }
 0x16c   :  { %v6490_v31 = vpop.f32.mrf.mxu0  ;;  %v6496_v32 = vpop.f32.mrf.mxu1 }
 0x16e   :  { %v7874_v62 = vpop.f32.mrf.mxu0  ;;  %v7876_v3 = vpop.f32.mrf.mxu1  ;;  %6788 = vmatmul.mubr.msk.bf16.vlgmr.msra.gmra.mxu0 %vm82_vm2, %v7610_v14  ;;  %6794 = vmatmul.mubr.msk.bf16.vlgmr.msra.gmra.mxu1 %vm82_vm2, %v7610_v14 }
 0x16f   :  { %6798 = vmatpush3.bf16.msra.mxu0 %v4144_v33  ;;  %6804 = vmatpush3.bf16.msra.mxu1 %v4188_v34 }
 0x170   :  { %v6501_v35 = vpop.f32.mrf.mxu0  ;;  %v6507_v36 = vpop.f32.mrf.mxu1  ;;  %6799 = vmatprep.mubr.msk.bf16.mxu0 %vm7018_vm1, %v7017_v0  ;;  %6805 = vmatprep.mubr.msk.bf16.mxu1 %vm7018_vm1, %v7017_v0 }
 0x171   :  { %6809 = vmatprep.subr.bf16.mxu0 %v7017_v0  ;;  %6815 = vmatprep.subr.bf16.mxu1 %v7017_v0  ;;  %v4584_v35 = vsel %vm86_vm0, %v2877_v57, 0  ;;  %v4628_v36 = vsel %vm86_vm0, %v2878_v58, 0 }
 0x172   :  { %v1933_v54 = vpop.f32.mrf.mxu0  ;;  %v1976_v7 = vpop.f32.mrf.mxu1 }
 0x173   :  { %v2879_v54 = vpack.c.bf16 %v7854_v49, %v7854_v49  ;;  %v2880_v7 = vpack.c.bf16 %v7856_v50, %v7856_v50 }
 0x174   :  { %v6502_v41 = vpop.f32.mrf.mxu0  ;;  %v6508_v42 = vpop.f32.mrf.mxu1 }
 0x176   :  { %v7894_v15 = vpop.f32.mrf.mxu0  ;;  %v7896_v16 = vpop.f32.mrf.mxu1  ;;  %6800 = vmatmul.mubr.msk.bf16.vlgmr.msra.gmra.mxu0 %vm82_vm2, %v7610_v14  ;;  %6806 = vmatmul.mubr.msk.bf16.vlgmr.msra.gmra.mxu1 %vm82_vm2, %v7610_v14 }
 0x177   :  { %6810 = vmatpush3.bf16.msra.mxu0 %v4232_v45  ;;  %6816 = vmatpush3.bf16.msra.mxu1 %v4276_v46 }
 0x178   :  { %v6513_v47 = vpop.f32.mrf.mxu0  ;;  %v6519_v48 = vpop.f32.mrf.mxu1  ;;  %6811 = vmatprep.mubr.msk.bf16.mxu0 %vm7018_vm1, %v7017_v0  ;;  %6817 = vmatprep.mubr.msk.bf16.mxu1 %vm7018_vm1, %v7017_v0 }
 0x179   :  { %6821 = vmatprep.subr.bf16.mxu0 %v7017_v0  ;;  %6827 = vmatprep.subr.bf16.mxu1 %v7017_v0  ;;  %v4672_v47 = vsel %vm86_vm0, %v2879_v54, 0  ;;  %v4716_v48 = vsel %vm86_vm0, %v2880_v7, 0 }
 0x17a   :  { %v2019_v63 = vpop.f32.mrf.mxu0  ;;  %v2062_v1 = vpop.f32.mrf.mxu1 }
 0x17b   :  { %v2881_v63 = vpack.c.bf16 %v7874_v62, %v7874_v62  ;;  %v2882_v1 = vpack.c.bf16 %v7876_v3, %v7876_v3 }
 0x17c   :  { %v6514_v51 = vpop.f32.mrf.mxu0  ;;  %v6520_v52 = vpop.f32.mrf.mxu1 }
 0x17e   :  { %v7914_v27 = vpop.f32.mrf.mxu0  ;;  %v7916_v28 = vpop.f32.mrf.mxu1  ;;  %6812 = vmatmul.mubr.msk.bf16.vlgmr.msra.gmra.mxu0 %vm82_vm2, %v7610_v14  ;;  %6818 = vmatmul.mubr.msk.bf16.vlgmr.msra.gmra.mxu1 %vm82_vm2, %v7610_v14 }
 0x17f   :  { %6822 = vmatpush3.bf16.msra.mxu0 %v4320_v59  ;;  %6828 = vmatpush3.bf16.msra.mxu1 %v4364_v2 }
 0x180   :  { %v6525_v60 = vpop.f32.mrf.mxu0  ;;  %v6531_v61 = vpop.f32.mrf.mxu1  ;;  %6823 = vmatprep.mubr.msk.bf16.mxu0 %vm7018_vm1, %v7017_v0  ;;  %6829 = vmatprep.mubr.msk.bf16.mxu1 %vm7018_vm1, %v7017_v0 }
 0x181   :  { %6833 = vmatprep.subr.bf16.mxu0 %v7017_v0  ;;  %6839 = vmatprep.subr.bf16.mxu1 %v7017_v0  ;;  %v4760_v60 = vsel %vm86_vm0, %v2881_v63, 0  ;;  %v4804_v61 = vsel %vm86_vm0, %v2882_v1, 0 }
 0x182   :  { %v2105_v11 = vpop.f32.mrf.mxu0  ;;  %v2148_v12 = vpop.f32.mrf.mxu1 }
 0x183   :  { %v2883_v11 = vpack.c.bf16 %v7894_v15, %v7894_v15  ;;  %v2884_v12 = vpack.c.bf16 %v7896_v16, %v7896_v16 }
 0x184   :  { %v6526_v53 = vpop.f32.mrf.mxu0  ;;  %v6532_v6 = vpop.f32.mrf.mxu1 }
 0x186   :  { %v7934_v39 = vpop.f32.mrf.mxu0  ;;  %v7936_v40 = vpop.f32.mrf.mxu1  ;;  %6824 = vmatmul.mubr.msk.bf16.vlgmr.msra.gmra.mxu0 %vm82_vm2, %v7610_v14  ;;  %6830 = vmatmul.mubr.msk.bf16.vlgmr.msra.gmra.mxu1 %vm82_vm2, %v7610_v14 }
 0x187   :  { %6834 = vmatpush3.bf16.msra.mxu0 %v4408_v8  ;;  %6840 = vmatpush3.bf16.msra.mxu1 %v4452_v9 }
 0x188   :  { %v6537_v10 = vpop.f32.mrf.mxu0  ;;  %v6543_v13 = vpop.f32.mrf.mxu1  ;;  %6835 = vmatprep.mubr.msk.bf16.mxu0 %vm7018_vm1, %v7017_v0  ;;  %6841 = vmatprep.mubr.msk.bf16.mxu1 %vm7018_vm1, %v7017_v0 }
 0x189   :  { %6845 = vmatprep.subr.bf16.mxu0 %v7017_v0  ;;  %6851 = vmatprep.subr.bf16.mxu1 %v7017_v0  ;;  %v4848_v10 = vsel %vm86_vm0, %v2883_v11, 0  ;;  %v4892_v13 = vsel %vm86_vm0, %v2884_v12, 0 }
 0x18a   :  { %v2191_v21 = vpop.f32.mrf.mxu0  ;;  %v2234_v22 = vpop.f32.mrf.mxu1 }
 0x18b   :  { %v2885_v21 = vpack.c.bf16 %v7914_v27, %v7914_v27  ;;  %v2886_v22 = vpack.c.bf16 %v7916_v28, %v7916_v28 }
 0x18c   :  { %v6538_v19 = vpop.f32.mrf.mxu0  ;;  %v6544_v20 = vpop.f32.mrf.mxu1 }
 0x18e   :  { %v7954_v55 = vpop.f32.mrf.mxu0  ;;  %v7956_v56 = vpop.f32.mrf.mxu1  ;;  %6836 = vmatmul.mubr.msk.bf16.vlgmr.msra.gmra.mxu0 %vm82_vm2, %v7610_v14  ;;  %6842 = vmatmul.mubr.msk.bf16.vlgmr.msra.gmra.mxu1 %vm82_vm2, %v7610_v14 }
 0x18f   :  { %6846 = vmatpush3.bf16.msra.mxu0 %v4496_v23  ;;  %6852 = vmatpush3.bf16.msra.mxu1 %v4540_v24 }
 0x190   :  { %v6549_v25 = vpop.f32.mrf.mxu0  ;;  %v6555_v26 = vpop.f32.mrf.mxu1  ;;  %6847 = vmatprep.mubr.msk.bf16.mxu0 %vm7018_vm1, %v7017_v0  ;;  %6853 = vmatprep.mubr.msk.bf16.mxu1 %vm7018_vm1, %v7017_v0 }
 0x191   :  { %6857 = vmatprep.subr.bf16.mxu0 %v7017_v0  ;;  %6863 = vmatprep.subr.bf16.mxu1 %v7017_v0  ;;  %v4936_v25 = vsel %vm86_vm0, %v2885_v21, 0  ;;  %v4980_v26 = vsel %vm86_vm0, %v2886_v22, 0 }
 0x192   :  { %v2277_v31 = vpop.f32.mrf.mxu0  ;;  %v2320_v32 = vpop.f32.mrf.mxu1 }
 0x193   :  { %v2887_v31 = vpack.c.bf16 %v7934_v39, %v7934_v39  ;;  %v2888_v32 = vpack.c.bf16 %v7936_v40, %v7936_v40 }
 0x194   :  { %v6550_v33 = vpop.f32.mrf.mxu0  ;;  %v6556_v34 = vpop.f32.mrf.mxu1 }
 0x196   :  { %v7974_v4 = vpop.f32.mrf.mxu0  ;;  %v7976_v5 = vpop.f32.mrf.mxu1  ;;  %6848 = vmatmul.mubr.msk.bf16.vlgmr.msra.gmra.mxu0 %vm82_vm2, %v7610_v14  ;;  %6854 = vmatmul.mubr.msk.bf16.vlgmr.msra.gmra.mxu1 %vm82_vm2, %v7610_v14 }
 0x197   :  { %6858 = vmatpush3.bf16.msra.mxu0 %v4584_v35  ;;  %6864 = vmatpush3.bf16.msra.mxu1 %v4628_v36 }
 0x198   :  { %v6561_v37 = vpop.f32.mrf.mxu0  ;;  %v6567_v38 = vpop.f32.mrf.mxu1  ;;  %6859 = vmatprep.mubr.msk.bf16.mxu0 %vm7018_vm1, %v7017_v0  ;;  %6865 = vmatprep.mubr.msk.bf16.mxu1 %vm7018_vm1, %v7017_v0 }
 0x199   :  { %6869 = vmatprep.subr.bf16.mxu0 %v7017_v0  ;;  %6875 = vmatprep.subr.bf16.mxu1 %v7017_v0  ;;  %v5024_v37 = vsel %vm86_vm0, %v2887_v31, 0  ;;  %v5068_v38 = vsel %vm86_vm0, %v2888_v32, 0 }
 0x19a   :  { %v2363_v41 = vpop.f32.mrf.mxu0  ;;  %v2406_v42 = vpop.f32.mrf.mxu1 }
 0x19b   :  { %v2889_v41 = vpack.c.bf16 %v7954_v55, %v7954_v55  ;;  %v2890_v42 = vpack.c.bf16 %v7956_v56, %v7956_v56 }
 0x19c   :  { %v6562_v45 = vpop.f32.mrf.mxu0  ;;  %v6568_v46 = vpop.f32.mrf.mxu1 }
 0x19e   :  { %v7994_v17 = vpop.f32.mrf.mxu0  ;;  %v7996_v18 = vpop.f32.mrf.mxu1  ;;  %6860 = vmatmul.mubr.msk.bf16.vlgmr.msra.gmra.mxu0 %vm82_vm2, %v7610_v14  ;;  %6866 = vmatmul.mubr.msk.bf16.vlgmr.msra.gmra.mxu1 %vm82_vm2, %v7610_v14 }
 0x19f   :  { %6870 = vmatpush3.bf16.msra.mxu0 %v4672_v47  ;;  %6876 = vmatpush3.bf16.msra.mxu1 %v4716_v48 }
 0x1a0   :  { %v6573_v49 = vpop.f32.mrf.mxu0  ;;  %v6579_v50 = vpop.f32.mrf.mxu1  ;;  %6871 = vmatprep.mubr.msk.bf16.mxu0 %vm7018_vm1, %v7017_v0  ;;  %6877 = vmatprep.mubr.msk.bf16.mxu1 %vm7018_vm1, %v7017_v0 }
 0x1a1   :  { %6881 = vmatprep.subr.bf16.mxu0 %v7017_v0  ;;  %6887 = vmatprep.subr.bf16.mxu1 %v7017_v0  ;;  %v5112_v49 = vsel %vm86_vm0, %v2889_v41, 0  ;;  %v5156_v50 = vsel %vm86_vm0, %v2890_v42, 0 }
 0x1a2   :  { %v2449_v51 = vpop.f32.mrf.mxu0  ;;  %v2492_v52 = vpop.f32.mrf.mxu1 }
 0x1a3   :  { %v2892_v51 = vpack.c.bf16 %v7976_v5, %v7976_v5 }
 0x1a4   :  { %v6574_v59 = vpop.f32.mrf.mxu0  ;;  %v6580_v2 = vpop.f32.mrf.mxu1 }
 0x1a6   :  { %v8014_v29 = vpop.f32.mrf.mxu0  ;;  %v8016_v30 = vpop.f32.mrf.mxu1  ;;  %6872 = vmatmul.mubr.msk.bf16.vlgmr.msra.gmra.mxu0 %vm82_vm2, %v7610_v14  ;;  %6878 = vmatmul.mubr.msk.bf16.vlgmr.msra.gmra.mxu1 %vm82_vm2, %v7610_v14 }
 0x1a7   :  { %6882 = vmatpush3.bf16.msra.mxu0 %v4760_v60  ;;  %6888 = vmatpush3.bf16.msra.mxu1 %v4804_v61 }
 0x1a8   :  { %v6585_v62 = vpop.f32.mrf.mxu0  ;;  %v6591_v3 = vpop.f32.mrf.mxu1  ;;  %6883 = vmatprep.mubr.msk.bf16.mxu0 %vm7018_vm1, %v7017_v0  ;;  %6889 = vmatprep.mubr.msk.bf16.mxu1 %vm7018_vm1, %v7017_v0 }
 0x1a9   :  { %6893 = vmatprep.subr.bf16.mxu0 %v7017_v0  ;;  %6899 = vmatprep.subr.bf16.mxu1 %v7017_v0  ;;  %v8129_v3 = vld [vmem:[%s8721_s2] sm:$0xff]  }
 0x1aa   :  { %v2535_v53 = vpop.f32.mrf.mxu0  ;;  %v2578_v6 = vpop.f32.mrf.mxu1 }
 0x1ab   :  { %v2893_v53 = vpack.c.bf16 %v7994_v17, %v7994_v17  ;;  %v2894_v6 = vpack.c.bf16 %v7996_v18, %v7996_v18 }
 0x1ac   :  { %v6586_v8 = vpop.f32.mrf.mxu0  ;;  %v6592_v9 = vpop.f32.mrf.mxu1 }
 0x1ad   :  { %v5332_v17 = vsel %vm86_vm0, %v2894_v6, 0 }
 0x1ae   :  { %v8034_v43 = vpop.f32.mrf.mxu0  ;;  %v8036_v44 = vpop.f32.mrf.mxu1  ;;  %6884 = vmatmul.mubr.msk.bf16.vlgmr.msra.gmra.mxu0 %vm82_vm2, %v7610_v14  ;;  %6890 = vmatmul.mubr.msk.bf16.vlgmr.msra.gmra.mxu1 %vm82_vm2, %v7610_v14 }
 0x1af   :  { %6894 = vmatpush3.bf16.msra.mxu0 %v4848_v10  ;;  %6900 = vmatpush3.bf16.msra.mxu1 %v4892_v13 }
 0x1b0   :  { %v6597_v15 = vpop.f32.mrf.mxu0  ;;  %v6603_v16 = vpop.f32.mrf.mxu1  ;;  %6895 = vmatprep.mubr.msk.bf16.mxu0 %vm7018_vm1, %v7017_v0  ;;  %6901 = vmatprep.mubr.msk.bf16.mxu1 %vm7018_vm1, %v7017_v0 }
 0x1b1   :  { %6905 = vmatprep.subr.bf16.mxu0 %v7017_v0  ;;  %6911 = vmatprep.subr.bf16.mxu1 %v7017_v0  ;;  %v5288_v15 = vsel %vm86_vm0, %v2893_v53, 0 }
 0x1b2   :  { %v2621_v19 = vpop.f32.mrf.mxu0  ;;  %v2664_v20 = vpop.f32.mrf.mxu1 }
 0x1b3   :  { %v2895_v19 = vpack.c.bf16 %v8014_v29, %v8014_v29  ;;  %v2896_v20 = vpack.c.bf16 %v8016_v30, %v8016_v30 }
 0x1b4   :  { %v6598_v23 = vpop.f32.mrf.mxu0  ;;  %v6604_v24 = vpop.f32.mrf.mxu1 }
 0x1b5   :  { %v5420_v29 = vsel %vm86_vm0, %v2896_v20, 0 }
 0x1b6   :  { %v8054_v57 = vpop.f32.mrf.mxu0  ;;  %v8056_v58 = vpop.f32.mrf.mxu1  ;;  %6896 = vmatmul.mubr.msk.bf16.vlgmr.msra.gmra.mxu0 %vm82_vm2, %v7610_v14  ;;  %6902 = vmatmul.mubr.msk.bf16.vlgmr.msra.gmra.mxu1 %vm82_vm2, %v7610_v14 }
 0x1b7   :  { %6906 = vmatpush3.bf16.msra.mxu0 %v4936_v25  ;;  %6912 = vmatpush3.bf16.msra.mxu1 %v4980_v26 }
 0x1b8   :  { %v6609_v27 = vpop.f32.mrf.mxu0  ;;  %v6615_v28 = vpop.f32.mrf.mxu1  ;;  %6907 = vmatprep.mubr.msk.bf16.mxu0 %vm7018_vm1, %v7017_v0  ;;  %6913 = vmatprep.mubr.msk.bf16.mxu1 %vm7018_vm1, %v7017_v0 }
 0x1b9   :  { %6917 = vmatprep.subr.bf16.mxu0 %v7017_v0  ;;  %6923 = vmatprep.subr.bf16.mxu1 %v7017_v0  ;;  %v5376_v27 = vsel %vm86_vm0, %v2895_v19, 0 }
 0x1ba   :  { %v2707_v33 = vpop.f32.mrf.mxu0  ;;  %v2750_v34 = vpop.f32.mrf.mxu1 }
 0x1bb   :  { %v2897_v33 = vpack.c.bf16 %v8034_v43, %v8034_v43  ;;  %v2898_v34 = vpack.c.bf16 %v8036_v44, %v8036_v44 }
 0x1bc   :  { %v6610_v35 = vpop.f32.mrf.mxu0  ;;  %v6616_v36 = vpop.f32.mrf.mxu1 }
 0x1bd   :  { %v5508_v43 = vsel %vm86_vm0, %v2898_v34, 0 }
 0x1be   :  { %v8074_v54 = vpop.f32.mrf.mxu0  ;;  %v8076_v7 = vpop.f32.mrf.mxu1  ;;  %6908 = vmatmul.mubr.msk.bf16.vlgmr.msra.gmra.mxu0 %vm82_vm2, %v7610_v14  ;;  %6914 = vmatmul.mubr.msk.bf16.vlgmr.msra.gmra.mxu1 %vm82_vm2, %v7610_v14 }
 0x1bf   :  { %6918 = vmatpush3.bf16.msra.mxu0 %v5024_v37  ;;  %6924 = vmatpush3.bf16.msra.mxu1 %v5068_v38 }
 0x1c0   :  { %v6621_v39 = vpop.f32.mrf.mxu0  ;;  %v6627_v40 = vpop.f32.mrf.mxu1  ;;  %6919 = vmatprep.mubr.msk.bf16.mxu0 %vm7018_vm1, %v7017_v0  ;;  %6925 = vmatprep.mubr.msk.bf16.mxu1 %vm7018_vm1, %v7017_v0 }
 0x1c1   :  { %6929 = vmatprep.subr.bf16.mxu0 %v7017_v0  ;;  %6935 = vmatprep.subr.bf16.mxu1 %v7017_v0  ;;  %v5464_v39 = vsel %vm86_vm0, %v2897_v33, 0 }
 0x1c2   :  { %v2793_v45 = vpop.f32.mrf.mxu0  ;;  %v2836_v46 = vpop.f32.mrf.mxu1 }
 0x1c3   :  { %v2899_v45 = vpack.c.bf16 %v8054_v57, %v8054_v57  ;;  %v2900_v46 = vpack.c.bf16 %v8056_v58, %v8056_v58 }
 0x1c4   :  { %v6622_v47 = vpop.f32.mrf.mxu0  ;;  %v6628_v48 = vpop.f32.mrf.mxu1 }
 0x1c5   :  { %v5596_v57 = vsel %vm86_vm0, %v2900_v46, 0 }
 0x1c6   :  { %v2948_v63 = vpop.f32.mrf.mxu0  ;;  %v2992_v1 = vpop.f32.mrf.mxu1  ;;  %6920 = vmatmul.mubr.msk.bf16.vlgmr.msra.gmra.mxu0 %vm82_vm2, %v7610_v14  ;;  %6926 = vmatmul.mubr.msk.bf16.vlgmr.msra.gmra.mxu1 %vm82_vm2, %v7610_v14  ;;  %v2891_v14 = vpack.c.bf16 %v7974_v4, %v7974_v4  ;;  %v5244_v4 = vsel %vm86_vm0, %v2892_v51, 0  ;;  %v2902_v51 = vpack.c.bf16 %v8076_v7, %v8076_v7 }
 0x1c7   :  { %5728 = vst.msk [vmem:[%s8722_s3] sm:$0xff] %vm5727_vm3, %v2948_v63  ;;  %5730 = vst.msk [vmem:[%s8722_s3 + $0x10] sm:$0xff] %vm5727_vm3, %v2992_v1  ;;  %6930 = vmatpush3.bf16.msra.mxu0 %v5112_v49  ;;  %6936 = vmatpush3.bf16.msra.mxu1 %v5156_v50  ;;  %v5552_v63 = vsel %vm86_vm0, %v2899_v45, 0 }
 0x1c8   :  { %v6633_v55 = vpop.f32.mrf.mxu0  ;;  %v6639_v56 = vpop.f32.mrf.mxu1  ;;  %6931 = vmatprep.mubr.msk.bf16.mxu0 %vm7018_vm1, %v7017_v0  ;;  %6937 = vmatprep.mubr.msk.bf16.mxu1 %vm7018_vm1, %v7017_v0  ;;  %v5200_v61 = vsel %vm86_vm0, %v2891_v14, 0  ;;  %v2901_v14 = vpack.c.bf16 %v8074_v54, %v8074_v54  ;;  %v5684_v54 = vsel %vm86_vm0, %v2902_v51, 0 }
 0x1c9   :  { %6941 = vmatprep.subr.bf16.mxu0 %v7017_v0  ;;  %6947 = vmatprep.subr.bf16.mxu1 %v7017_v0 }
 0x1ca   :  { %v2951_v52 = vpop.f32.mrf.mxu0  ;;  %v2995_v59 = vpop.f32.mrf.mxu1 }
 0x1cb   :  { %5729 = vst.msk [vmem:[%s8722_s3 + $0x8] sm:$0xff] %vm5727_vm3, %v2951_v52  ;;  %5731 = vst.msk [vmem:[%s8722_s3 + $0x18] sm:$0xff] %vm5727_vm3, %v2995_v59 }
 0x1cc   :  { %v6634_v2 = vpop.f32.mrf.mxu0  ;;  %v6640_v60 = vpop.f32.mrf.mxu1 }
 0x1ce   :  { %v3036_v62 = vpop.f32.mrf.mxu0  ;;  %v3080_v5 = vpop.f32.mrf.mxu1  ;;  %6932 = vmatmul.mubr.msk.bf16.vlgmr.msra.gmra.mxu0 %vm82_vm2, %v8129_v3  ;;  %6938 = vmatmul.mubr.msk.bf16.vlgmr.msra.gmra.mxu1 %vm82_vm2, %v8129_v3 }
 0x1cf   :  { %5732 = vst.msk [vmem:[%s8722_s3 + $0x20] sm:$0xff] %vm5727_vm3, %v3036_v62  ;;  %5734 = vst.msk [vmem:[%s8722_s3 + $0x30] sm:$0xff] %vm5727_vm3, %v3080_v5  ;;  %6942 = vmatpush3.bf16.msra.mxu0 %v5200_v61  ;;  %6948 = vmatpush3.bf16.msra.mxu1 %v5244_v4  ;;  %v5640_v61 = vsel %vm86_vm0, %v2901_v14, 0 }
 0x1d0   :  { %v6645_v11 = vpop.f32.mrf.mxu0  ;;  %v6651_v12 = vpop.f32.mrf.mxu1  ;;  %6943 = vmatprep.mubr.msk.bf16.mxu0 %vm7018_vm1, %v7017_v0  ;;  %6949 = vmatprep.mubr.msk.bf16.mxu1 %vm7018_vm1, %v7017_v0 }
 0x1d1   :  { %6953 = vmatprep.subr.bf16.mxu0 %v7017_v0  ;;  %6959 = vmatprep.subr.bf16.mxu1 %v7017_v0 }
 0x1d2   :  { %v3039_v8 = vpop.f32.mrf.mxu0  ;;  %v3083_v9 = vpop.f32.mrf.mxu1 }
 0x1d3   :  { %5733 = vst.msk [vmem:[%s8722_s3 + $0x28] sm:$0xff] %vm5727_vm3, %v3039_v8  ;;  %5735 = vst.msk [vmem:[%s8722_s3 + $0x38] sm:$0xff] %vm5727_vm3, %v3083_v9 }
 0x1d4   :  { %v6646_v10 = vpop.f32.mrf.mxu0  ;;  %v6652_v13 = vpop.f32.mrf.mxu1 }
 0x1d6   :  { %v3124_v16 = vpop.f32.mrf.mxu0  ;;  %v3168_v18 = vpop.f32.mrf.mxu1  ;;  %6944 = vmatmul.mubr.msk.bf16.vlgmr.msra.gmra.mxu0 %vm82_vm2, %v8129_v3  ;;  %6950 = vmatmul.mubr.msk.bf16.vlgmr.msra.gmra.mxu1 %vm82_vm2, %v8129_v3 }
 0x1d7   :  { %5736 = vst.msk [vmem:[%s8722_s3 + $0x40] sm:$0xff] %vm5727_vm3, %v3124_v16  ;;  %5738 = vst.msk [vmem:[%s8722_s3 + $0x50] sm:$0xff] %vm5727_vm3, %v3168_v18  ;;  %6954 = vmatpush3.bf16.msra.mxu0 %v5288_v15  ;;  %6960 = vmatpush3.bf16.msra.mxu1 %v5332_v17 }
 0x1d8   :  { %v6657_v21 = vpop.f32.mrf.mxu0  ;;  %v6663_v22 = vpop.f32.mrf.mxu1  ;;  %6955 = vmatprep.mubr.msk.bf16.mxu0 %vm7018_vm1, %v7017_v0  ;;  %6961 = vmatprep.mubr.msk.bf16.mxu1 %vm7018_vm1, %v7017_v0 }
 0x1d9   :  { %6965 = vmatprep.subr.bf16.mxu0 %v7017_v0  ;;  %6971 = vmatprep.subr.bf16.mxu1 %v7017_v0 }
 0x1da   :  { %v3127_v23 = vpop.f32.mrf.mxu0  ;;  %v3171_v24 = vpop.f32.mrf.mxu1 }
 0x1db   :  { %5737 = vst.msk [vmem:[%s8722_s3 + $0x48] sm:$0xff] %vm5727_vm3, %v3127_v23  ;;  %5739 = vst.msk [vmem:[%s8722_s3 + $0x58] sm:$0xff] %vm5727_vm3, %v3171_v24 }
 0x1dc   :  { %v6658_v25 = vpop.f32.mrf.mxu0  ;;  %v6664_v26 = vpop.f32.mrf.mxu1 }
 0x1de   :  { %v3212_v28 = vpop.f32.mrf.mxu0  ;;  %v3256_v30 = vpop.f32.mrf.mxu1  ;;  %6956 = vmatmul.mubr.msk.bf16.vlgmr.msra.gmra.mxu0 %vm82_vm2, %v8129_v3  ;;  %6962 = vmatmul.mubr.msk.bf16.vlgmr.msra.gmra.mxu1 %vm82_vm2, %v8129_v3 }
 0x1df   :  { %5740 = vst.msk [vmem:[%s8722_s3 + $0x60] sm:$0xff] %vm5727_vm3, %v3212_v28  ;;  %5742 = vst.msk [vmem:[%s8722_s3 + $0x70] sm:$0xff] %vm5727_vm3, %v3256_v30  ;;  %6966 = vmatpush3.bf16.msra.mxu0 %v5376_v27  ;;  %6972 = vmatpush3.bf16.msra.mxu1 %v5420_v29 }
 0x1e0   :  { %v6669_v31 = vpop.f32.mrf.mxu0  ;;  %v6675_v32 = vpop.f32.mrf.mxu1  ;;  %6967 = vmatprep.mubr.msk.bf16.mxu0 %vm7018_vm1, %v7017_v0  ;;  %6973 = vmatprep.mubr.msk.bf16.mxu1 %vm7018_vm1, %v7017_v0 }
 0x1e1   :  { %6977 = vmatprep.subr.bf16.mxu0 %v7017_v0  ;;  %6983 = vmatprep.subr.bf16.mxu1 %v7017_v0 }
 0x1e2   :  { %v3215_v35 = vpop.f32.mrf.mxu0  ;;  %v3259_v36 = vpop.f32.mrf.mxu1 }
 0x1e3   :  { %5741 = vst.msk [vmem:[%s8722_s3 + $0x68] sm:$0xff] %vm5727_vm3, %v3215_v35  ;;  %5743 = vst.msk [vmem:[%s8722_s3 + $0x78] sm:$0xff] %vm5727_vm3, %v3259_v36 }
 0x1e4   :  { %v6670_v37 = vpop.f32.mrf.mxu0  ;;  %v6676_v38 = vpop.f32.mrf.mxu1 }
 0x1e6   :  { %v3300_v40 = vpop.f32.mrf.mxu0  ;;  %v3344_v44 = vpop.f32.mrf.mxu1  ;;  %6968 = vmatmul.mubr.msk.bf16.vlgmr.msra.gmra.mxu0 %vm82_vm2, %v8129_v3  ;;  %6974 = vmatmul.mubr.msk.bf16.vlgmr.msra.gmra.mxu1 %vm82_vm2, %v8129_v3 }
 0x1e7   :  { %5744 = vst.msk [vmem:[%s8722_s3 + $0x80] sm:$0xff] %vm5727_vm3, %v3300_v40  ;;  %5746 = vst.msk [vmem:[%s8722_s3 + $0x90] sm:$0xff] %vm5727_vm3, %v3344_v44  ;;  %6978 = vmatpush3.bf16.msra.mxu0 %v5464_v39  ;;  %6984 = vmatpush3.bf16.msra.mxu1 %v5508_v43 }
 0x1e8   :  { %v6681_v41 = vpop.f32.mrf.mxu0  ;;  %v6687_v42 = vpop.f32.mrf.mxu1  ;;  %6979 = vmatprep.mubr.msk.bf16.mxu0 %vm7018_vm1, %v7017_v0  ;;  %6985 = vmatprep.mubr.msk.bf16.mxu1 %vm7018_vm1, %v7017_v0 }
 0x1e9   :  { %6989 = vmatprep.subr.bf16.mxu0 %v7017_v0  ;;  %6995 = vmatprep.subr.bf16.mxu1 %v7017_v0 }
 0x1ea   :  { %v3303_v47 = vpop.f32.mrf.mxu0  ;;  %v3347_v48 = vpop.f32.mrf.mxu1 }
 0x1eb   :  { %5745 = vst.msk [vmem:[%s8722_s3 + $0x88] sm:$0xff] %vm5727_vm3, %v3303_v47  ;;  %5747 = vst.msk [vmem:[%s8722_s3 + $0x98] sm:$0xff] %vm5727_vm3, %v3347_v48 }
 0x1ec   :  { %v6682_v49 = vpop.f32.mrf.mxu0  ;;  %v6688_v50 = vpop.f32.mrf.mxu1 }
 0x1ee   :  { %v3388_v1 = vpop.f32.mrf.mxu0  ;;  %v3432_v58 = vpop.f32.mrf.mxu1  ;;  %6980 = vmatmul.mubr.msk.bf16.vlgmr.msra.gmra.mxu0 %vm82_vm2, %v8129_v3  ;;  %6986 = vmatmul.mubr.msk.bf16.vlgmr.msra.gmra.mxu1 %vm82_vm2, %v8129_v3 }
 0x1ef   :  { %5748 = vst.msk [vmem:[%s8722_s3 + $0xa0] sm:$0xff] %vm5727_vm3, %v3388_v1  ;;  %5750 = vst.msk [vmem:[%s8722_s3 + $0xb0] sm:$0xff] %vm5727_vm3, %v3432_v58  ;;  %6990 = vmatpush3.bf16.msra.mxu0 %v5552_v63  ;;  %6996 = vmatpush3.bf16.msra.mxu1 %v5596_v57 }
 0x1f0   :  { %v6693_v55 = vpop.f32.mrf.mxu0  ;;  %v6699_v56 = vpop.f32.mrf.mxu1  ;;  %6991 = vmatprep.mubr.msk.bf16.mxu0 %vm7018_vm1, %v7017_v0  ;;  %6997 = vmatprep.mubr.msk.bf16.mxu1 %vm7018_vm1, %v7017_v0 }
 0x1f1   :  { %7001 = vmatprep.subr.bf16.mxu0 %v7017_v0  ;;  %7007 = vmatprep.subr.bf16.mxu1 %v7017_v0 }
 0x1f2   :  { %v3391_v52 = vpop.f32.mrf.mxu0  ;;  %v3435_v59 = vpop.f32.mrf.mxu1 }
 0x1f3   :  { %5749 = vst.msk [vmem:[%s8722_s3 + $0xa8] sm:$0xff] %vm5727_vm3, %v3391_v52  ;;  %5751 = vst.msk [vmem:[%s8722_s3 + $0xb8] sm:$0xff] %vm5727_vm3, %v3435_v59 }
 0x1f4   :  { %v6694_v2 = vpop.f32.mrf.mxu0  ;;  %v6700_v60 = vpop.f32.mrf.mxu1 }
 0x1f6   :  { %v3476_v4 = vpop.f32.mrf.mxu0  ;;  %v3520_v7 = vpop.f32.mrf.mxu1  ;;  %6992 = vmatmul.mubr.msk.bf16.vlgmr.msra.gmra.mxu0 %vm82_vm2, %v8129_v3  ;;  %6998 = vmatmul.mubr.msk.bf16.vlgmr.msra.gmra.mxu1 %vm82_vm2, %v8129_v3 }
 0x1f7   :  { %5752 = vst.msk [vmem:[%s8722_s3 + $0xc0] sm:$0xff] %vm5727_vm3, %v3476_v4  ;;  %5754 = vst.msk [vmem:[%s8722_s3 + $0xd0] sm:$0xff] %vm5727_vm3, %v3520_v7  ;;  %7002 = vmatpush3.bf16.msra.mxu0 %v5640_v61  ;;  %7008 = vmatpush3.bf16.msra.mxu1 %v5684_v54 }
 0x1f8   :  { %v6705_v62 = vpop.f32.mrf.mxu0  ;;  %v6711_v5 = vpop.f32.mrf.mxu1  ;;  %7003 = vmatprep.mubr.msk.bf16.mxu0 %vm7018_vm1, %v7017_v0  ;;  %7009 = vmatprep.mubr.msk.bf16.mxu1 %vm7018_vm1, %v7017_v0 }
 0x1fa   :  { %v3479_v11 = vpop.f32.mrf.mxu0  ;;  %v3523_v12 = vpop.f32.mrf.mxu1 }
 0x1fb   :  { %5753 = vst.msk [vmem:[%s8722_s3 + $0xc8] sm:$0xff] %vm5727_vm3, %v3479_v11  ;;  %5755 = vst.msk [vmem:[%s8722_s3 + $0xd8] sm:$0xff] %vm5727_vm3, %v3523_v12 }
 0x1fc   :  { %v6706_v53 = vpop.f32.mrf.mxu0  ;;  %v6712_v6 = vpop.f32.mrf.mxu1 }
 0x1fe   :  { %v3564_v8 = vpop.f32.mrf.mxu0  ;;  %v3608_v9 = vpop.f32.mrf.mxu1  ;;  %7004 = vmatmul.mubr.msk.bf16.vlgmr.msra.gmra.mxu0 %vm82_vm2, %v8129_v3  ;;  %7010 = vmatmul.mubr.msk.bf16.vlgmr.msra.gmra.mxu1 %vm82_vm2, %v8129_v3 }
 0x1ff   :  { %5756 = vst.msk [vmem:[%s8722_s3 + $0xe0] sm:$0xff] %vm5727_vm3, %v3564_v8  ;;  %5758 = vst.msk [vmem:[%s8722_s3 + $0xf0] sm:$0xff] %vm5727_vm3, %v3608_v9 }
 0x200   :  { %v6717_v0 = vpop.f32.mrf.mxu0  ;;  %v6723_v10 = vpop.f32.mrf.mxu1 }
 0x202   :  { %v3567_v13 = vpop.f32.mrf.mxu0  ;;  %v3611_v15 = vpop.f32.mrf.mxu1 }
 0x203   :  { %5757 = vst.msk [vmem:[%s8722_s3 + $0xe8] sm:$0xff] %vm5727_vm3, %v3567_v13  ;;  %5759 = vst.msk [vmem:[%s8722_s3 + $0xf8] sm:$0xff] %vm5727_vm3, %v3611_v15 }
 0x204   :  { %v6718_v3 = vpop.f32.mrf.mxu0  ;;  %v6724_v17 = vpop.f32.mrf.mxu1 }
 0x206   :  { %v3652_v16 = vpop.f32.mrf.mxu0  ;;  %v3696_v18 = vpop.f32.mrf.mxu1 }
 0x207   :  { %5760 = vst.msk [vmem:[%s8722_s3 + $0x100] sm:$0xff] %vm5727_vm3, %v3652_v16  ;;  %5762 = vst.msk [vmem:[%s8722_s3 + $0x110] sm:$0xff] %vm5727_vm3, %v3696_v18 }
 0x208   :  { %v6729_v21 = vpop.f32.mrf.mxu0  ;;  %v6735_v22 = vpop.f32.mrf.mxu1 }
 0x20a   :  { %v3655_v19 = vpop.f32.mrf.mxu0  ;;  %v3699_v20 = vpop.f32.mrf.mxu1 }
 0x20b   :  { %5761 = vst.msk [vmem:[%s8722_s3 + $0x108] sm:$0xff] %vm5727_vm3, %v3655_v19  ;;  %5763 = vst.msk [vmem:[%s8722_s3 + $0x118] sm:$0xff] %vm5727_vm3, %v3699_v20 }
 0x20c   :  { %v6730_v23 = vpop.f32.mrf.mxu0  ;;  %v6736_v24 = vpop.f32.mrf.mxu1 }
 0x20e   :  { %v3740_v25 = vpop.f32.mrf.mxu0  ;;  %v3784_v26 = vpop.f32.mrf.mxu1 }
 0x20f   :  { %5764 = vst.msk [vmem:[%s8722_s3 + $0x120] sm:$0xff] %vm5727_vm3, %v3740_v25  ;;  %5766 = vst.msk [vmem:[%s8722_s3 + $0x130] sm:$0xff] %vm5727_vm3, %v3784_v26 }
 0x210   :  { %v6741_v27 = vpop.f32.mrf.mxu0  ;;  %v6747_v29 = vpop.f32.mrf.mxu1 }
 0x212   :  { %v3743_v28 = vpop.f32.mrf.mxu0  ;;  %v3787_v30 = vpop.f32.mrf.mxu1 }
 0x213   :  { %5765 = vst.msk [vmem:[%s8722_s3 + $0x128] sm:$0xff] %vm5727_vm3, %v3743_v28  ;;  %5767 = vst.msk [vmem:[%s8722_s3 + $0x138] sm:$0xff] %vm5727_vm3, %v3787_v30 }
 0x214   :  { %v6742_v31 = vpop.f32.mrf.mxu0  ;;  %v6748_v32 = vpop.f32.mrf.mxu1 }
 0x216   :  { %v3828_v33 = vpop.f32.mrf.mxu0  ;;  %v3872_v34 = vpop.f32.mrf.mxu1 }
 0x217   :  { %5768 = vst.msk [vmem:[%s8722_s3 + $0x140] sm:$0xff] %vm5727_vm3, %v3828_v33  ;;  %5770 = vst.msk [vmem:[%s8722_s3 + $0x150] sm:$0xff] %vm5727_vm3, %v3872_v34 }
 0x218   :  { %v6753_v35 = vpop.f32.mrf.mxu0  ;;  %v6759_v36 = vpop.f32.mrf.mxu1 }
 0x21a   :  { %v3831_v37 = vpop.f32.mrf.mxu0  ;;  %v3875_v38 = vpop.f32.mrf.mxu1 }
 0x21b   :  { %5769 = vst.msk [vmem:[%s8722_s3 + $0x148] sm:$0xff] %vm5727_vm3, %v3831_v37  ;;  %5771 = vst.msk [vmem:[%s8722_s3 + $0x158] sm:$0xff] %vm5727_vm3, %v3875_v38 }
 0x21c   :  { %v6754_v39 = vpop.f32.mrf.mxu0  ;;  %v6760_v43 = vpop.f32.mrf.mxu1 }
 0x21e   :  { %v3916_v40 = vpop.f32.mrf.mxu0  ;;  %v3960_v44 = vpop.f32.mrf.mxu1 }
 0x21f   :  { %5772 = vst.msk [vmem:[%s8722_s3 + $0x160] sm:$0xff] %vm5727_vm3, %v3916_v40  ;;  %5774 = vst.msk [vmem:[%s8722_s3 + $0x170] sm:$0xff] %vm5727_vm3, %v3960_v44 }
 0x220   :  { %v6765_v41 = vpop.f32.mrf.mxu0  ;;  %v6771_v42 = vpop.f32.mrf.mxu1 }
 0x222   :  { %v3919_v45 = vpop.f32.mrf.mxu0  ;;  %v3963_v46 = vpop.f32.mrf.mxu1 }
 0x223   :  { %5773 = vst.msk [vmem:[%s8722_s3 + $0x168] sm:$0xff] %vm5727_vm3, %v3919_v45  ;;  %5775 = vst.msk [vmem:[%s8722_s3 + $0x178] sm:$0xff] %vm5727_vm3, %v3963_v46 }
 0x224   :  { %v6766_v47 = vpop.f32.mrf.mxu0  ;;  %v6772_v48 = vpop.f32.mrf.mxu1 }
 0x226   :  { %v4004_v49 = vpop.f32.mrf.mxu0  ;;  %v4048_v50 = vpop.f32.mrf.mxu1 }
 0x227   :  { %5776 = vst.msk [vmem:[%s8722_s3 + $0x180] sm:$0xff] %vm5727_vm3, %v4004_v49  ;;  %5778 = vst.msk [vmem:[%s8722_s3 + $0x190] sm:$0xff] %vm5727_vm3, %v4048_v50 }
 0x228   :  { %v6777_v63 = vpop.f32.mrf.mxu0  ;;  %v6783_v57 = vpop.f32.mrf.mxu1 }
 0x22a   :  { %v4007_v1 = vpop.f32.mrf.mxu0  ;;  %v4051_v58 = vpop.f32.mrf.mxu1 }
 0x22b   :  { %5777 = vst.msk [vmem:[%s8722_s3 + $0x188] sm:$0xff] %vm5727_vm3, %v4007_v1  ;;  %5779 = vst.msk [vmem:[%s8722_s3 + $0x198] sm:$0xff] %vm5727_vm3, %v4051_v58 }
 0x22c   :  { %v6778_v55 = vpop.f32.mrf.mxu0  ;;  %v6784_v56 = vpop.f32.mrf.mxu1 }
 0x22e   :  { %v4092_v14 = vpop.f32.mrf.mxu0  ;;  %v4136_v51 = vpop.f32.mrf.mxu1 }
 0x22f   :  { %5780 = vst.msk [vmem:[%s8722_s3 + $0x1a0] sm:$0xff] %vm5727_vm3, %v4092_v14  ;;  %5782 = vst.msk [vmem:[%s8722_s3 + $0x1b0] sm:$0xff] %vm5727_vm3, %v4136_v51 }
 0x230   :  { %v6789_v52 = vpop.f32.mrf.mxu0  ;;  %v6795_v59 = vpop.f32.mrf.mxu1 }
 0x232   :  { %v4095_v2 = vpop.f32.mrf.mxu0  ;;  %v4139_v60 = vpop.f32.mrf.mxu1 }
 0x233   :  { %5781 = vst.msk [vmem:[%s8722_s3 + $0x1a8] sm:$0xff] %vm5727_vm3, %v4095_v2  ;;  %5783 = vst.msk [vmem:[%s8722_s3 + $0x1b8] sm:$0xff] %vm5727_vm3, %v4139_v60 }
 0x234   :  { %v6790_v61 = vpop.f32.mrf.mxu0  ;;  %v6796_v54 = vpop.f32.mrf.mxu1 }
 0x236   :  { %v4180_v4 = vpop.f32.mrf.mxu0  ;;  %v4224_v7 = vpop.f32.mrf.mxu1 }
 0x237   :  { %5784 = vst.msk [vmem:[%s8722_s3 + $0x1c0] sm:$0xff] %vm5727_vm3, %v4180_v4  ;;  %5786 = vst.msk [vmem:[%s8722_s3 + $0x1d0] sm:$0xff] %vm5727_vm3, %v4224_v7 }
 0x238   :  { %v6801_v62 = vpop.f32.mrf.mxu0  ;;  %v6807_v5 = vpop.f32.mrf.mxu1 }
 0x23a   :  { %v4183_v11 = vpop.f32.mrf.mxu0  ;;  %v4227_v12 = vpop.f32.mrf.mxu1 }
 0x23b   :  { %5785 = vst.msk [vmem:[%s8722_s3 + $0x1c8] sm:$0xff] %vm5727_vm3, %v4183_v11  ;;  %5787 = vst.msk [vmem:[%s8722_s3 + $0x1d8] sm:$0xff] %vm5727_vm3, %v4227_v12 }
 0x23c   :  { %v6802_v53 = vpop.f32.mrf.mxu0  ;;  %v6808_v6 = vpop.f32.mrf.mxu1 }
 0x23e   :  { %v4268_v8 = vpop.f32.mrf.mxu0  ;;  %v4312_v9 = vpop.f32.mrf.mxu1 }
 0x23f   :  { %5788 = vst.msk [vmem:[%s8722_s3 + $0x1e0] sm:$0xff] %vm5727_vm3, %v4268_v8  ;;  %5790 = vst.msk [vmem:[%s8722_s3 + $0x1f0] sm:$0xff] %vm5727_vm3, %v4312_v9 }
 0x240   :  { %v6813_v0 = vpop.f32.mrf.mxu0  ;;  %v6819_v10 = vpop.f32.mrf.mxu1 }
 0x242   :  { %v4271_v13 = vpop.f32.mrf.mxu0  ;;  %v4315_v15 = vpop.f32.mrf.mxu1 }
 0x243   :  { %5789 = vst.msk [vmem:[%s8722_s3 + $0x1e8] sm:$0xff] %vm5727_vm3, %v4271_v13  ;;  %5791 = vst.msk [vmem:[%s8722_s3 + $0x1f8] sm:$0xff] %vm5727_vm3, %v4315_v15 }
 0x244   :  { %v6814_v3 = vpop.f32.mrf.mxu0  ;;  %v6820_v17 = vpop.f32.mrf.mxu1 }
 0x246   :  { %v4356_v16 = vpop.f32.mrf.mxu0  ;;  %v4400_v18 = vpop.f32.mrf.mxu1 }
 0x247   :  { %5792 = vst.msk [vmem:[%s8722_s3 + $0x200] sm:$0xff] %vm5727_vm3, %v4356_v16  ;;  %5794 = vst.msk [vmem:[%s8722_s3 + $0x210] sm:$0xff] %vm5727_vm3, %v4400_v18 }
 0x248   :  { %v6825_v21 = vpop.f32.mrf.mxu0  ;;  %v6831_v22 = vpop.f32.mrf.mxu1 }
 0x24a   :  { %v4359_v19 = vpop.f32.mrf.mxu0  ;;  %v4403_v20 = vpop.f32.mrf.mxu1 }
 0x24b   :  { %5793 = vst.msk [vmem:[%s8722_s3 + $0x208] sm:$0xff] %vm5727_vm3, %v4359_v19  ;;  %5795 = vst.msk [vmem:[%s8722_s3 + $0x218] sm:$0xff] %vm5727_vm3, %v4403_v20 }
 0x24c   :  { %v6826_v23 = vpop.f32.mrf.mxu0  ;;  %v6832_v24 = vpop.f32.mrf.mxu1 }
 0x24e   :  { %v4444_v25 = vpop.f32.mrf.mxu0  ;;  %v4488_v26 = vpop.f32.mrf.mxu1 }
 0x24f   :  { %5796 = vst.msk [vmem:[%s8722_s3 + $0x220] sm:$0xff] %vm5727_vm3, %v4444_v25  ;;  %5798 = vst.msk [vmem:[%s8722_s3 + $0x230] sm:$0xff] %vm5727_vm3, %v4488_v26 }
 0x250   :  { %v6837_v27 = vpop.f32.mrf.mxu0  ;;  %v6843_v29 = vpop.f32.mrf.mxu1 }
 0x252   :  { %v4447_v28 = vpop.f32.mrf.mxu0  ;;  %v4491_v30 = vpop.f32.mrf.mxu1 }
 0x253   :  { %5797 = vst.msk [vmem:[%s8722_s3 + $0x228] sm:$0xff] %vm5727_vm3, %v4447_v28  ;;  %5799 = vst.msk [vmem:[%s8722_s3 + $0x238] sm:$0xff] %vm5727_vm3, %v4491_v30 }
 0x254   :  { %v6838_v31 = vpop.f32.mrf.mxu0  ;;  %v6844_v32 = vpop.f32.mrf.mxu1 }
 0x256   :  { %v4532_v33 = vpop.f32.mrf.mxu0  ;;  %v4576_v34 = vpop.f32.mrf.mxu1 }
 0x257   :  { %5800 = vst.msk [vmem:[%s8722_s3 + $0x240] sm:$0xff] %vm5727_vm3, %v4532_v33  ;;  %5802 = vst.msk [vmem:[%s8722_s3 + $0x250] sm:$0xff] %vm5727_vm3, %v4576_v34 }
 0x258   :  { %v6849_v35 = vpop.f32.mrf.mxu0  ;;  %v6855_v36 = vpop.f32.mrf.mxu1 }
 0x25a   :  { %v4535_v37 = vpop.f32.mrf.mxu0  ;;  %v4579_v38 = vpop.f32.mrf.mxu1 }
 0x25b   :  { %5801 = vst.msk [vmem:[%s8722_s3 + $0x248] sm:$0xff] %vm5727_vm3, %v4535_v37  ;;  %5803 = vst.msk [vmem:[%s8722_s3 + $0x258] sm:$0xff] %vm5727_vm3, %v4579_v38 }
 0x25c   :  { %v6850_v39 = vpop.f32.mrf.mxu0  ;;  %v6856_v43 = vpop.f32.mrf.mxu1 }
 0x25e   :  { %v4620_v40 = vpop.f32.mrf.mxu0  ;;  %v4664_v44 = vpop.f32.mrf.mxu1 }
 0x25f   :  { %5804 = vst.msk [vmem:[%s8722_s3 + $0x260] sm:$0xff] %vm5727_vm3, %v4620_v40  ;;  %5806 = vst.msk [vmem:[%s8722_s3 + $0x270] sm:$0xff] %vm5727_vm3, %v4664_v44 }
 0x260   :  { %v6861_v41 = vpop.f32.mrf.mxu0  ;;  %v6867_v42 = vpop.f32.mrf.mxu1 }
 0x262   :  { %v4623_v45 = vpop.f32.mrf.mxu0  ;;  %v4667_v46 = vpop.f32.mrf.mxu1 }
 0x263   :  { %5805 = vst.msk [vmem:[%s8722_s3 + $0x268] sm:$0xff] %vm5727_vm3, %v4623_v45  ;;  %5807 = vst.msk [vmem:[%s8722_s3 + $0x278] sm:$0xff] %vm5727_vm3, %v4667_v46 }
 0x264   :  { %v6862_v47 = vpop.f32.mrf.mxu0  ;;  %v6868_v48 = vpop.f32.mrf.mxu1 }
 0x266   :  { %v4708_v49 = vpop.f32.mrf.mxu0  ;;  %v4752_v50 = vpop.f32.mrf.mxu1 }
 0x267   :  { %5808 = vst.msk [vmem:[%s8722_s3 + $0x280] sm:$0xff] %vm5727_vm3, %v4708_v49  ;;  %5810 = vst.msk [vmem:[%s8722_s3 + $0x290] sm:$0xff] %vm5727_vm3, %v4752_v50 }
 0x268   :  { %v6873_v63 = vpop.f32.mrf.mxu0  ;;  %v6879_v57 = vpop.f32.mrf.mxu1 }
 0x26a   :  { %v4711_v1 = vpop.f32.mrf.mxu0  ;;  %v4755_v58 = vpop.f32.mrf.mxu1 }
 0x26b   :  { %5809 = vst.msk [vmem:[%s8722_s3 + $0x288] sm:$0xff] %vm5727_vm3, %v4711_v1  ;;  %5811 = vst.msk [vmem:[%s8722_s3 + $0x298] sm:$0xff] %vm5727_vm3, %v4755_v58 }
 0x26c   :  { %v6874_v55 = vpop.f32.mrf.mxu0  ;;  %v6880_v56 = vpop.f32.mrf.mxu1 }
 0x26e   :  { %v4796_v14 = vpop.f32.mrf.mxu0  ;;  %v4840_v51 = vpop.f32.mrf.mxu1 }
 0x26f   :  { %5812 = vst.msk [vmem:[%s8722_s3 + $0x2a0] sm:$0xff] %vm5727_vm3, %v4796_v14  ;;  %5814 = vst.msk [vmem:[%s8722_s3 + $0x2b0] sm:$0xff] %vm5727_vm3, %v4840_v51 }
 0x270   :  { %v6885_v52 = vpop.f32.mrf.mxu0  ;;  %v6891_v59 = vpop.f32.mrf.mxu1 }
 0x272   :  { %v4799_v2 = vpop.f32.mrf.mxu0  ;;  %v4843_v60 = vpop.f32.mrf.mxu1 }
 0x273   :  { %5813 = vst.msk [vmem:[%s8722_s3 + $0x2a8] sm:$0xff] %vm5727_vm3, %v4799_v2  ;;  %5815 = vst.msk [vmem:[%s8722_s3 + $0x2b8] sm:$0xff] %vm5727_vm3, %v4843_v60 }
 0x274   :  { %v6886_v61 = vpop.f32.mrf.mxu0  ;;  %v6892_v54 = vpop.f32.mrf.mxu1 }
 0x276   :  { %v4884_v4 = vpop.f32.mrf.mxu0  ;;  %v4928_v7 = vpop.f32.mrf.mxu1 }
 0x277   :  { %5816 = vst.msk [vmem:[%s8722_s3 + $0x2c0] sm:$0xff] %vm5727_vm3, %v4884_v4  ;;  %5818 = vst.msk [vmem:[%s8722_s3 + $0x2d0] sm:$0xff] %vm5727_vm3, %v4928_v7 }
 0x278   :  { %v6897_v62 = vpop.f32.mrf.mxu0  ;;  %v6903_v5 = vpop.f32.mrf.mxu1 }
 0x27a   :  { %v4887_v11 = vpop.f32.mrf.mxu0  ;;  %v4931_v12 = vpop.f32.mrf.mxu1 }
 0x27b   :  { %5817 = vst.msk [vmem:[%s8722_s3 + $0x2c8] sm:$0xff] %vm5727_vm3, %v4887_v11  ;;  %5819 = vst.msk [vmem:[%s8722_s3 + $0x2d8] sm:$0xff] %vm5727_vm3, %v4931_v12 }
 0x27c   :  { %v6898_v53 = vpop.f32.mrf.mxu0  ;;  %v6904_v6 = vpop.f32.mrf.mxu1 }
 0x27e   :  { %v4972_v8 = vpop.f32.mrf.mxu0  ;;  %v5016_v9 = vpop.f32.mrf.mxu1 }
 0x27f   :  { %5820 = vst.msk [vmem:[%s8722_s3 + $0x2e0] sm:$0xff] %vm5727_vm3, %v4972_v8  ;;  %5822 = vst.msk [vmem:[%s8722_s3 + $0x2f0] sm:$0xff] %vm5727_vm3, %v5016_v9 }
 0x280   :  { %v6909_v0 = vpop.f32.mrf.mxu0  ;;  %v6915_v10 = vpop.f32.mrf.mxu1 }
 0x282   :  { %v4975_v13 = vpop.f32.mrf.mxu0  ;;  %v5019_v15 = vpop.f32.mrf.mxu1 }
 0x283   :  { %5821 = vst.msk [vmem:[%s8722_s3 + $0x2e8] sm:$0xff] %vm5727_vm3, %v4975_v13  ;;  %5823 = vst.msk [vmem:[%s8722_s3 + $0x2f8] sm:$0xff] %vm5727_vm3, %v5019_v15 }
 0x284   :  { %v6910_v3 = vpop.f32.mrf.mxu0  ;;  %v6916_v17 = vpop.f32.mrf.mxu1 }
 0x286   :  { %v5060_v16 = vpop.f32.mrf.mxu0  ;;  %v5104_v18 = vpop.f32.mrf.mxu1 }
 0x287   :  { %5824 = vst.msk [vmem:[%s8722_s3 + $0x300] sm:$0xff] %vm5727_vm3, %v5060_v16  ;;  %5826 = vst.msk [vmem:[%s8722_s3 + $0x310] sm:$0xff] %vm5727_vm3, %v5104_v18 }
 0x288   :  { %v6921_v21 = vpop.f32.mrf.mxu0  ;;  %v6927_v22 = vpop.f32.mrf.mxu1 }
 0x28a   :  { %v5063_v19 = vpop.f32.mrf.mxu0  ;;  %v5107_v20 = vpop.f32.mrf.mxu1 }
 0x28b   :  { %5825 = vst.msk [vmem:[%s8722_s3 + $0x308] sm:$0xff] %vm5727_vm3, %v5063_v19  ;;  %5827 = vst.msk [vmem:[%s8722_s3 + $0x318] sm:$0xff] %vm5727_vm3, %v5107_v20 }
 0x28c   :  { %v6922_v23 = vpop.f32.mrf.mxu0  ;;  %v6928_v24 = vpop.f32.mrf.mxu1 }
 0x28e   :  { %v5148_v25 = vpop.f32.mrf.mxu0  ;;  %v5192_v26 = vpop.f32.mrf.mxu1 }
 0x28f   :  { %5828 = vst.msk [vmem:[%s8722_s3 + $0x320] sm:$0xff] %vm5727_vm3, %v5148_v25  ;;  %5830 = vst.msk [vmem:[%s8722_s3 + $0x330] sm:$0xff] %vm5727_vm3, %v5192_v26 }
 0x290   :  { %v6933_v27 = vpop.f32.mrf.mxu0  ;;  %v6939_v29 = vpop.f32.mrf.mxu1 }
 0x292   :  { %v5151_v28 = vpop.f32.mrf.mxu0  ;;  %v5195_v30 = vpop.f32.mrf.mxu1 }
 0x293   :  { %5829 = vst.msk [vmem:[%s8722_s3 + $0x328] sm:$0xff] %vm5727_vm3, %v5151_v28  ;;  %5831 = vst.msk [vmem:[%s8722_s3 + $0x338] sm:$0xff] %vm5727_vm3, %v5195_v30 }
 0x294   :  { %v6934_v31 = vpop.f32.mrf.mxu0  ;;  %v6940_v32 = vpop.f32.mrf.mxu1 }
 0x296   :  { %v5236_v33 = vpop.f32.mrf.mxu0  ;;  %v5280_v34 = vpop.f32.mrf.mxu1 }
 0x297   :  { %5832 = vst.msk [vmem:[%s8722_s3 + $0x340] sm:$0xff] %vm5727_vm3, %v5236_v33  ;;  %5834 = vst.msk [vmem:[%s8722_s3 + $0x350] sm:$0xff] %vm5727_vm3, %v5280_v34 }
 0x298   :  { %v6945_v35 = vpop.f32.mrf.mxu0  ;;  %v6951_v36 = vpop.f32.mrf.mxu1 }
 0x29a   :  { %v5239_v37 = vpop.f32.mrf.mxu0  ;;  %v5283_v38 = vpop.f32.mrf.mxu1 }
 0x29b   :  { %5833 = vst.msk [vmem:[%s8722_s3 + $0x348] sm:$0xff] %vm5727_vm3, %v5239_v37  ;;  %5835 = vst.msk [vmem:[%s8722_s3 + $0x358] sm:$0xff] %vm5727_vm3, %v5283_v38 }
 0x29c   :  { %v6946_v39 = vpop.f32.mrf.mxu0  ;;  %v6952_v43 = vpop.f32.mrf.mxu1 }
 0x29e   :  { %v5324_v40 = vpop.f32.mrf.mxu0  ;;  %v5368_v44 = vpop.f32.mrf.mxu1 }
 0x29f   :  { %5836 = vst.msk [vmem:[%s8722_s3 + $0x360] sm:$0xff] %vm5727_vm3, %v5324_v40  ;;  %5838 = vst.msk [vmem:[%s8722_s3 + $0x370] sm:$0xff] %vm5727_vm3, %v5368_v44 }
 0x2a0   :  { %v6957_v41 = vpop.f32.mrf.mxu0  ;;  %v6963_v42 = vpop.f32.mrf.mxu1 }
 0x2a2   :  { %v5327_v45 = vpop.f32.mrf.mxu0  ;;  %v5371_v46 = vpop.f32.mrf.mxu1 }
 0x2a3   :  { %5837 = vst.msk [vmem:[%s8722_s3 + $0x368] sm:$0xff] %vm5727_vm3, %v5327_v45  ;;  %5839 = vst.msk [vmem:[%s8722_s3 + $0x378] sm:$0xff] %vm5727_vm3, %v5371_v46 }
 0x2a4   :  { %v6958_v47 = vpop.f32.mrf.mxu0  ;;  %v6964_v48 = vpop.f32.mrf.mxu1 }
 0x2a6   :  { %v5412_v49 = vpop.f32.mrf.mxu0  ;;  %v5456_v50 = vpop.f32.mrf.mxu1 }
 0x2a7   :  { %5840 = vst.msk [vmem:[%s8722_s3 + $0x380] sm:$0xff] %vm5727_vm3, %v5412_v49  ;;  %5842 = vst.msk [vmem:[%s8722_s3 + $0x390] sm:$0xff] %vm5727_vm3, %v5456_v50 }
 0x2a8   :  { %v6969_v63 = vpop.f32.mrf.mxu0  ;;  %v6975_v57 = vpop.f32.mrf.mxu1 }
 0x2aa   :  { %v5415_v1 = vpop.f32.mrf.mxu0  ;;  %v5459_v58 = vpop.f32.mrf.mxu1 }
 0x2ab   :  { %5841 = vst.msk [vmem:[%s8722_s3 + $0x388] sm:$0xff] %vm5727_vm3, %v5415_v1  ;;  %5843 = vst.msk [vmem:[%s8722_s3 + $0x398] sm:$0xff] %vm5727_vm3, %v5459_v58 }
 0x2ac   :  { %v6970_v55 = vpop.f32.mrf.mxu0  ;;  %v6976_v56 = vpop.f32.mrf.mxu1 }
 0x2ae   :  { %v5500_v14 = vpop.f32.mrf.mxu0  ;;  %v5544_v51 = vpop.f32.mrf.mxu1 }
 0x2af   :  { %5844 = vst.msk [vmem:[%s8722_s3 + $0x3a0] sm:$0xff] %vm5727_vm3, %v5500_v14  ;;  %5846 = vst.msk [vmem:[%s8722_s3 + $0x3b0] sm:$0xff] %vm5727_vm3, %v5544_v51 }
 0x2b0   :  { %v6981_v52 = vpop.f32.mrf.mxu0  ;;  %v6987_v59 = vpop.f32.mrf.mxu1 }
 0x2b2   :  { %v5503_v2 = vpop.f32.mrf.mxu0  ;;  %v5547_v60 = vpop.f32.mrf.mxu1 }
 0x2b3   :  { %5845 = vst.msk [vmem:[%s8722_s3 + $0x3a8] sm:$0xff] %vm5727_vm3, %v5503_v2  ;;  %5847 = vst.msk [vmem:[%s8722_s3 + $0x3b8] sm:$0xff] %vm5727_vm3, %v5547_v60 }
 0x2b4   :  { %v6982_v61 = vpop.f32.mrf.mxu0  ;;  %v6988_v54 = vpop.f32.mrf.mxu1 }
 0x2b6   :  { %v5588_v4 = vpop.f32.mrf.mxu0  ;;  %v5632_v7 = vpop.f32.mrf.mxu1 }
 0x2b7   :  { %5848 = vst.msk [vmem:[%s8722_s3 + $0x3c0] sm:$0xff] %vm5727_vm3, %v5588_v4  ;;  %5850 = vst.msk [vmem:[%s8722_s3 + $0x3d0] sm:$0xff] %vm5727_vm3, %v5632_v7 }
 0x2b8   :  { %v6993_v62 = vpop.f32.mrf.mxu0  ;;  %v6999_v5 = vpop.f32.mrf.mxu1 }
 0x2ba   :  { %v5591_v11 = vpop.f32.mrf.mxu0  ;;  %v5635_v12 = vpop.f32.mrf.mxu1 }
 0x2bb   :  { %5849 = vst.msk [vmem:[%s8722_s3 + $0x3c8] sm:$0xff] %vm5727_vm3, %v5591_v11  ;;  %5851 = vst.msk [vmem:[%s8722_s3 + $0x3d8] sm:$0xff] %vm5727_vm3, %v5635_v12 }
 0x2bc   :  { %v6994_v53 = vpop.f32.mrf.mxu0  ;;  %v7000_v6 = vpop.f32.mrf.mxu1 }
 0x2be   :  { %v5676_v8 = vpop.f32.mrf.mxu0  ;;  %v5720_v9 = vpop.f32.mrf.mxu1 }
 0x2bf   :  { %5852 = vst.msk [vmem:[%s8722_s3 + $0x3e0] sm:$0xff] %vm5727_vm3, %v5676_v8  ;;  %5854 = vst.msk [vmem:[%s8722_s3 + $0x3f0] sm:$0xff] %vm5727_vm3, %v5720_v9 }
 0x2c0   :  { %v7005_v0 = vpop.f32.mrf.mxu0  ;;  %v7011_v10 = vpop.f32.mrf.mxu1 }
 0x2c2   :  { %v5679_v13 = vpop.f32.mrf.mxu0  ;;  %v5723_v15 = vpop.f32.mrf.mxu1 }
 0x2c3   :  { %5853 = vst.msk [vmem:[%s8722_s3 + $0x3e8] sm:$0xff] %vm5727_vm3, %v5679_v13  ;;  %5855 = vst.msk [vmem:[%s8722_s3 + $0x3f8] sm:$0xff] %vm5727_vm3, %v5723_v15 }
 0x2c4   :  { %v7006_v3 = vpop.f32.mrf.mxu0  ;;  %v7012_v17 = vpop.f32.mrf.mxu1 }

</bundles_post_ra>
